<compile_context>
chip_gen: v7x
topology: tpu7x:2x2x1
jax: 0.10.0
libtpu: 0.0.40
codegen_flags: <defaults>
</compile_context>

<pallas_src>
import functools

import jax
import jax.numpy as jnp
from jax import lax
from jax.experimental import pallas as pl
from jax.experimental.pallas import tpu as pltpu

CP = 128                         # padded output-channel lane group for plain convs
BN_EPS = 1e-5                    # nn.BatchNorm2d default
WHOLE_M_VMEM_BUDGET = 12 << 20   # whole-layer BN block must stay well under the
                                 # 32 MiB scoped-VMEM default (v7x phys = 64 MiB)


# --------------------------------------------------------------------------- helpers
def _pad_last_to(a, mult=128):
    pad = (-a.shape[-1]) % mult
    if pad == 0:
        return a
    widths = [(0, 0)] * (a.ndim - 1) + [(0, pad)]
    return jnp.pad(a, widths)


def _pad_vec(v, n):
    out = jnp.zeros((n,), jnp.float32)
    return out if v is None else out.at[: v.shape[0]].set(v.astype(jnp.float32))


def _pick_tile(m, target=512):
    """Largest divisor of m that is a multiple of 16, <= target and yields >= 2
    row blocks (megacore on v7x); falls back to one whole-m block."""
    best = 0
    top = min(m // 2, target)
    for t in range(16, top + 1, 16):
        if m % t == 0:
            best = t
    return best if best else m


def _im2col(x, kh, kw):
    """x: (N, Hp, Wp, C) already spatially padded -> ((N*H*W, kh*kw*C), H, W)."""
    n, hp, wp, c = x.shape
    h, w = hp - kh + 1, wp - kw + 1
    if kh == 1 and kw == 1:
        return x.reshape(n * h * w, c), h, w
    cols = [x[:, a:a + h, b:b + w, :] for a in range(kh) for b in range(kw)]
    return jnp.concatenate(cols, axis=-1).reshape(n * h * w, kh * kw * c), h, w


# --------------------------------------------------------------------------- kernels
def _fused_conv_kernel(*refs, in_relu, do_bn, bn_relu, phase_stride, inv_count):
    """relu?(patches)[bf16] @ W[bf16] + bias  (+ whole-block BatchNorm (+ReLU))."""
    x_ref, w_ref, b_ref = refs[0], refs[1], refs[2]
    if do_bn:
        g_ref, bt_ref, o_ref = refs[3], refs[4], refs[5]
    else:
        o_ref = refs[3]

    xt = x_ref[...]
    if in_relu:
        xt = jnp.maximum(xt, jnp.zeros((), xt.dtype))
    acc = jnp.dot(xt, w_ref[...], preferred_element_type=jnp.float32)
    acc = acc + b_ref[...]

    if do_bn:
        n = acc.shape[-1]
        nph = n // phase_stride

        def phase_total(v):           # (1, n) per-lane -> per-channel totals,
            tot = v                   # replicated into every phase slot (XLU roll)
            for p in range(1, nph):
                tot = tot + pltpu.roll(v, shift=p * phase_stride, axis=1)
            return tot

        mean = phase_total(jnp.sum(acc, axis=0, keepdims=True)) * inv_count
        d = acc - mean                # centered second pass on resident data
        var = phase_total(jnp.sum(d * d, axis=0, keepdims=True)) * inv_count
        scale = g_ref[...] * lax.rsqrt(var + BN_EPS)
        shift = bt_ref[...] - mean * scale
        acc = acc * scale + shift
        if bn_relu:
            acc = jnp.maximum(acc, 0.0)

    o_ref[...] = acc.astype(o_ref.dtype)


def _res_block_kernel(p_ref, w3_ref, w1_ref, r_ref, o_ref):
    """One residual block: x + conv1x1(relu(conv3x3(relu(x)))); intermediate stays
    in VMEM/vregs (no HBM round trip between the two matmuls)."""
    xt = jnp.maximum(p_ref[...], jnp.zeros((), p_ref.dtype))
    h = jnp.dot(xt, w3_ref[...], preferred_element_type=jnp.float32)
    h = jnp.maximum(h, 0.0).astype(w1_ref.dtype)
    y = jnp.dot(h, w1_ref[...], preferred_element_type=jnp.float32)
    o_ref[...] = (y + r_ref[...]).astype(o_ref.dtype)


def _conv_partial_stats_kernel(x_ref, w_ref, b_ref, o_ref, st_ref, *, in_relu):
    """Tiled conv; emits per-tile (sum, centered-M2) partial BN statistics."""
    xt = x_ref[...]
    if in_relu:
        xt = jnp.maximum(xt, jnp.zeros((), xt.dtype))
    acc = jnp.dot(xt, w_ref[...], preferred_element_type=jnp.float32) + b_ref[...]
    o_ref[...] = acc
    s = jnp.sum(acc, axis=0, keepdims=True)
    d = acc - s * (1.0 / acc.shape[0])
    m2 = jnp.sum(d * d, axis=0, keepdims=True)
    st_ref[0] = jnp.concatenate([s, m2], axis=0)


def _affine_kernel(y_ref, sc_ref, sh_ref, o_ref, *, relu):
    y = y_ref[...] * sc_ref[...] + sh_ref[...]
    if relu:
        y = jnp.maximum(y, 0.0)
    o_ref[...] = y


# --------------------------------------------------------------------------- fused layer driver
def _fused_layer(patches, w, bias, *, in_relu=False, bn=None, bn_relu=False,
                 phase_stride=None):
    """(M, K)bf16 @ (K, N)bf16 -> (M, N)f32 with bias (+BatchNorm(+ReLU)) fused."""
    M, K = patches.shape
    N = w.shape[1]
    if phase_stride is None:
        phase_stride = N
    b2d = bias.reshape(1, N)

    if bn is None:
        tm = _pick_tile(M)
        kern = functools.partial(_fused_conv_kernel, in_relu=in_relu, do_bn=False,
                                 bn_relu=False, phase_stride=phase_stride,
                                 inv_count=1.0)
        return pl.pallas_call(
            kern,
            out_shape=jax.ShapeDtypeStruct((M, N), jnp.float32),
            grid=(M // tm,),
            in_specs=[pl.BlockSpec((tm, K), lambda i: (i, 0)),
                      pl.BlockSpec((K, N), lambda i: (0, 0)),
                      pl.BlockSpec((1, N), lambda i: (0, 0))],
            out_specs=pl.BlockSpec((tm, N), lambda i: (i, 0)),
            compiler_params=pltpu.CompilerParams(
                dimension_semantics=("parallel",)),
        )(patches, w, b2d)

    gamma, beta = bn                     # already padded / phase-tiled to length N
    nph = N // phase_stride
    count = float(M * nph)               # elements per channel (batch statistics)

    # Whole-layer-resident BN block: conservative estimate incl. double buffers.
    est_bytes = 2 * (M * K * 2 + K * N * 2 + M * N * 4) + 6 * N * 4
    if est_bytes <= WHOLE_M_VMEM_BUDGET:
        kern = functools.partial(_fused_conv_kernel, in_relu=in_relu, do_bn=True,
                                 bn_relu=bn_relu, phase_stride=phase_stride,
                                 inv_count=1.0 / count)
        return pl.pallas_call(
            kern,
            out_shape=jax.ShapeDtypeStruct((M, N), jnp.float32),
            grid=(1,),
            in_specs=[pl.BlockSpec((M, K), lambda i: (0, 0)),
                      pl.BlockSpec((K, N), lambda i: (0, 0)),
                      pl.BlockSpec((1, N), lambda i: (0, 0)),
                      pl.BlockSpec((1, N), lambda i: (0, 0)),
                      pl.BlockSpec((1, N), lambda i: (0, 0))],
            out_specs=pl.BlockSpec((M, N), lambda i: (0, 0)),
            compiler_params=pltpu.CompilerParams(
                dimension_semantics=("arbitrary",),
                vmem_limit_bytes=32 * 1024 * 1024),   # v5e default is only 16 MiB
        )(patches, w, b2d, gamma.reshape(1, N), beta.reshape(1, N))

    # ---- Fallback for large layers (v7x 64 MiB VMEM): tiled conv with per-tile
    #      partial stats, tiny wrapper combine, tiled affine(+ReLU) pass.
    tm = _pick_tile(M)
    nt = M // tm
    kern = functools.partial(_conv_partial_stats_kernel, in_relu=in_relu)
    y, stats = pl.pallas_call(
        kern,
        out_shape=(jax.ShapeDtypeStruct((M, N), jnp.float32),
                   jax.ShapeDtypeStruct((nt, 2, N), jnp.float32)),
        grid=(nt,),
        in_specs=[pl.BlockSpec((tm, K), lambda i: (i, 0)),
                  pl.BlockSpec((K, N), lambda i: (0, 0)),
                  pl.BlockSpec((1, N), lambda i: (0, 0))],
        out_specs=(pl.BlockSpec((tm, N), lambda i: (i, 0)),
                   pl.BlockSpec((1, 2, N), lambda i: (i, 0, 0))),
        compiler_params=pltpu.CompilerParams(dimension_semantics=("parallel",)),
    )(patches, w, b2d)

    sums, m2s = stats[:, 0, :], stats[:, 1, :]                      # (nt, N)
    lane_sum = jnp.sum(sums, axis=0)                                # (N,)
    ch_mean = jnp.tile(lane_sum.reshape(nph, phase_stride).sum(0) / count, nph)
    m2_lane = jnp.sum(m2s, axis=0) + tm * jnp.sum((sums / tm - ch_mean) ** 2, axis=0)
    ch_var = jnp.tile(m2_lane.reshape(nph, phase_stride).sum(0) / count, nph)
    scale = gamma * lax.rsqrt(ch_var + BN_EPS)
    shift = beta - ch_mean * scale

    kern2 = functools.partial(_affine_kernel, relu=bn_relu)
    return pl.pallas_call(
        kern2,
        out_shape=jax.ShapeDtypeStruct((M, N), jnp.float32),
        grid=(nt,),
        in_specs=[pl.BlockSpec((tm, N), lambda i: (i, 0)),
                  pl.BlockSpec((1, N), lambda i: (0, 0)),
                  pl.BlockSpec((1, N), lambda i: (0, 0))],
        out_specs=pl.BlockSpec((tm, N), lambda i: (i, 0)),
        compiler_params=pltpu.CompilerParams(dimension_semantics=("parallel",)),
    )(y, scale.reshape(1, N), shift.reshape(1, N))


# --------------------------------------------------------------------------- layer wrappers (XLA glue only)
def conv2d(x, w_oihw, bias=None, pad=0, in_relu=False, bn=None, bn_relu=False):
    """x: (N,H,W,C>=I) f32 NHWC; w: PyTorch Conv2d layout (O,I,kh,kw)."""
    O, I, kh, kw = w_oihw.shape
    xr = x[..., :I]                                   # real channels only (dense K)
    if pad:
        xr = jnp.pad(xr, ((0, 0), (pad, pad), (pad, pad), (0, 0)))
    patches, H, W = _im2col(xr.astype(jnp.bfloat16), kh, kw)
    patches = _pad_last_to(patches)                   # K padded to multiple of 128
    K = patches.shape[1]
    Nb = x.shape[0]

    wt = jnp.transpose(w_oihw, (2, 3, 1, 0)).reshape(kh * kw * I, O)   # tap-major
    wp = jnp.zeros((K, CP), jnp.float32).at[:kh * kw * I, :O].set(wt)
    wp = wp.astype(jnp.bfloat16)
    bn_p = None if bn is None else (_pad_vec(bn[0], CP), _pad_vec(bn[1], CP))
    y = _fused_layer(patches, wp, _pad_vec(bias, CP), in_relu=in_relu,
                     bn=bn_p, bn_relu=bn_relu)
    return y.reshape(Nb, H, W, CP)


def residual_block(x, w3_oihw, w1_oihw):
    """One fused pallas_call per residual block (both convs are bias-free)."""
    Rh, C = w3_oihw.shape[0], w3_oihw.shape[1]
    Nb = x.shape[0]
    xr = jnp.pad(x[..., :C], ((0, 0), (1, 1), (1, 1), (0, 0)))
    patches, H, W = _im2col(xr.astype(jnp.bfloat16), 3, 3)
    patches = _pad_last_to(patches)
    M, K = patches.shape

    w3 = jnp.transpose(w3_oihw, (2, 3, 1, 0)).reshape(9 * C, Rh)
    w3 = jnp.zeros((K, CP), jnp.float32).at[:9 * C, :Rh].set(w3).astype(jnp.bfloat16)
    w1m = jnp.transpose(w1_oihw.reshape(w1_oihw.shape[0], Rh), (1, 0))   # (Rh, Cout)
    w1 = jnp.zeros((CP, CP), jnp.float32).at[:Rh, :w1m.shape[1]].set(w1m)
    w1 = w1.astype(jnp.bfloat16)
    res2d = x.reshape(M, CP)                          # un-ReLU'd residual, f32

    tm = _pick_tile(M)
    y = pl.pallas_call(
        _res_block_kernel,
        out_shape=jax.ShapeDtypeStruct((M, CP), jnp.float32),
        grid=(M // tm,),
        in_specs=[pl.BlockSpec((tm, K), lambda i: (i, 0)),
                  pl.BlockSpec((K, CP), lambda i: (0, 0)),
                  pl.BlockSpec((CP, CP), lambda i: (0, 0)),
                  pl.BlockSpec((tm, CP), lambda i: (i, 0))],
        out_specs=pl.BlockSpec((tm, CP), lambda i: (i, 0)),
        compiler_params=pltpu.CompilerParams(dimension_semantics=("parallel",)),
    )(patches, w3, w1, res2d)
    return y.reshape(Nb, H, W, CP)


def conv_transpose2d(x, w_iohw, bias, pad, in_relu=False, bn=None, bn_relu=False):
    """Stride-2 ConvTranspose2d via sub-pixel phase decomposition.  The four
    output phases are packed into ONE lane group of width 4*cph (cph = real
    out-channels rounded to 32), so the output stays 128-lane dense without
    4x padded columns.  x: (N,H,W,C>=I) f32; w: PyTorch layout (I,O,k,k)."""
    I, O, k, _ = w_iohw.shape
    Nb, Hin, Win = x.shape[0], x.shape[1], x.shape[2]
    Hout = (Hin - 1) * 2 - 2 * pad + k
    Wout = (Win - 1) * 2 - 2 * pad + k
    Ho2, Wo2 = Hout // 2, Wout // 2

    # input-row offsets feeding the two output phases (oh = 2*ih - pad + kh)
    offs = sorted({(ph + pad - kk) // 2 for ph in (0, 1) for kk in range(k)
                   if (kk - ph - pad) % 2 == 0})
    omin, T = offs[0], offs[-1] - offs[0] + 1

    xr = x[..., :I]
    xp = lax.pad(xr, jnp.float32(0.0),
                 ((0, 0, 0),
                  (-omin, (omin + Ho2 + T - 1) - Hin, 0),
                  (-omin, (omin + Wo2 + T - 1) - Win, 0),
                  (0, 0, 0)))
    patches, Hc, Wc = _im2col(xp.astype(jnp.bfloat16), T, T)
    assert (Hc, Wc) == (Ho2, Wo2)
    patches = _pad_last_to(patches)
    M, K = patches.shape

    cph = -(-O // 32) * 32                 # per-phase lane stride; 4*cph % 128 == 0
    N = 4 * cph
    wb = jnp.zeros((T * T, I, 4, cph), jnp.float32)
    for ph in (0, 1):
        for pw in (0, 1):
            for a in range(T):
                kh = ph + pad - 2 * (omin + a)
                if not 0 <= kh < k:
                    continue
                for b in range(T):
                    kw_ = pw + pad - 2 * (omin + b)
                    if not 0 <= kw_ < k:
                        continue
                    wb = wb.at[a * T + b, :, 2 * ph + pw, :O].set(w_iohw[:, :, kh, kw_])
    wb = jnp.zeros((K, N), jnp.float32).at[:T * T * I].set(wb.reshape(T * T * I, N))
    wb = wb.astype(jnp.bfloat16)

    bb = jnp.tile(_pad_vec(bias, cph), 4)
    bn_p = None if bn is None else (jnp.tile(_pad_vec(bn[0], cph), 4),
                                    jnp.tile(_pad_vec(bn[1], cph), 4))
    y = _fused_layer(patches, wb, bb, in_relu=in_relu, bn=bn_p, bn_relu=bn_relu,
                     phase_stride=cph)
    # pixel shuffle: (M, 4*cph) -> (N, Hout, Wout, cph)
    # TODO(synk): fold this interleave into the output index_map / next layer's
    #             in-kernel im2col to avoid one HBM round trip per up-layer.
    y = y.reshape(Nb, Ho2, Wo2, 2, 2, cph).transpose(0, 1, 3, 2, 4, 5)
    return y.reshape(Nb, Hout, Wout, cph)


# --------------------------------------------------------------------------- decoder
def init_decoder_params(key, in_channels, out_channels, num_hiddens,
                        num_residual_layers, num_residual_hiddens,
                        num_downsample_layers, extra_conv):
    keys = iter(jax.random.split(key, 128))

    def unif(shape, fan_in):
        bound = (6.0 / fan_in) ** 0.5
        return jax.random.uniform(next(keys), shape, jnp.float32, -bound, bound)

    def bias(shape):
        return jax.random.uniform(next(keys), shape, jnp.float32, -0.1, 0.1)

    p = {}
    p["conv1_w"] = unif((num_hiddens, in_channels, 3, 3), in_channels * 9)
    p["conv1_b"] = bias((num_hiddens,))
    p["bn1_g"] = jnp.ones((num_hiddens,), jnp.float32)
    p["bn1_b"] = jnp.zeros((num_hiddens,), jnp.float32)

    p["res"] = []
    for _ in range(num_residual_layers):
        w3 = unif((num_residual_hiddens, num_hiddens, 3, 3), num_hiddens * 9)
        w1 = unif((num_hiddens, num_residual_hiddens, 1, 1), num_residual_hiddens)
        p["res"].append((w3, w1))

    if extra_conv:
        p["extra_w"] = unif((num_hiddens, num_hiddens, 2, 2), num_hiddens * 4)
        p["extra_b"] = bias((num_hiddens,))
        p["bn_extra_g"] = jnp.ones((num_hiddens,), jnp.float32)
        p["bn_extra_b"] = jnp.zeros((num_hiddens,), jnp.float32)

    p["up"] = []
    for m in range(num_downsample_layers - 1):
        ci = num_hiddens // 2 ** m
        co = num_hiddens // 2 ** (m + 1)
        p["up"].append((unif((ci, co, 4, 4), ci * 16), bias((co,)),
                        jnp.ones((co,), jnp.float32), jnp.zeros((co,), jnp.float32)))

    ci = num_hiddens // 2 ** (num_downsample_layers - 1)
    p["ct1_w"] = unif((ci, out_channels, 4, 4), ci * 16)
    p["ct1_b"] = bias((out_channels,))
    return p


def decoder_forward(params, x_nchw):
    x = jnp.transpose(x_nchw, (0, 2, 3, 1)).astype(jnp.float32)   # NCHW -> NHWC

    # conv_1 + bn_1 (no ReLU here: the residual stack applies its own ReLUs)
    x = conv2d(x, params["conv1_w"], params["conv1_b"], pad=1,
               bn=(params["bn1_g"], params["bn1_b"]), bn_relu=False)

    # residual stack: each block = ONE fused pallas_call (3x3 -> ReLU -> 1x1 -> +x)
    for (w3, w1) in params["res"]:
        x = residual_block(x, w3, w1)
    pending_relu = True   # trailing F.relu of ResidualStack, folded into next kernel

    if "extra_w" in params:   # ConvTranspose2d(k=2, s=2, p=2) + BN + ReLU
        x = conv_transpose2d(x, params["extra_w"], params["extra_b"], pad=2,
                             in_relu=pending_relu,
                             bn=(params["bn_extra_g"], params["bn_extra_b"]),
                             bn_relu=True)
        pending_relu = False

    for (w, b, g, bt) in params["up"]:   # ConvTranspose2d(k=4, s=2, p=1) + BN + ReLU
        x = conv_transpose2d(x, w, b, pad=1, in_relu=pending_relu,
                             bn=(g, bt), bn_relu=True)
        pending_relu = False

    # final ConvTranspose2d(k=4, s=2, p=1): bias only, no BN / ReLU
    x = conv_transpose2d(x, params["ct1_w"], params["ct1_b"], pad=1,
                         in_relu=pending_relu)

    out_channels = params["ct1_w"].shape[1]
    return jnp.transpose(x[..., :out_channels], (0, 3, 1, 2))     # back to NCHW


# --------------------------------------------------------------------------- main
if __name__ == "__main__":
    # Decoder(in_channels=4, out_channels=3, num_hiddens=32,
    #         num_residual_layers=2, num_residual_hiddens=8,
    #         num_downsample_layers=2, extraConv=False)
    in_channels, out_channels = 4, 3
    num_hiddens, num_res_layers, num_res_hiddens = 32, 2, 8
    num_downsample_layers, extra_conv = 2, False

    key = jax.random.PRNGKey(0)
    k_params, k_x = jax.random.split(key)
    params = init_decoder_params(k_params, in_channels, out_channels, num_hiddens,
                                 num_res_layers, num_res_hiddens,
                                 num_downsample_layers, extra_conv)

    x = jax.random.normal(k_x, (2, 4, 8, 8), jnp.float32)  # NCHW, like PyTorch

    out = jax.jit(decoder_forward)(params, x)
    out = jax.block_until_ready(out)

    expected = (2, out_channels,
                8 * 2 ** num_downsample_layers, 8 * 2 ** num_downsample_layers)
    assert out.shape == expected, (out.shape, expected)
    assert bool(jnp.all(jnp.isfinite(out)))
    print("KERNEL_OK")
</pallas_src>

<mosaic_0001>
module attributes {stable_mosaic.version = 11 : i64} {
  func.func @_fused_conv_kernel(%arg0: i32, %arg1: memref<128x128xbf16, #tpu.memory_space<vmem>>, %arg2: memref<128x128xbf16, #tpu.memory_space<vmem>>, %arg3: memref<1x128xf32, #tpu.memory_space<vmem>>, %arg4: memref<1x128xf32, #tpu.memory_space<vmem>>, %arg5: memref<1x128xf32, #tpu.memory_space<vmem>>, %arg6: memref<128x128xf32, #tpu.memory_space<vmem>>) attributes {dimension_semantics = [#tpu.dimension_semantics<arbitrary>], iteration_bounds = array<i64: 1>, scalar_prefetch = 0 : i64, scratch_operands = 0 : i64, tpu.core_type = #tpu.core_type<tc>, window_params = [{pipeline_mode = #tpu.pipeline_mode<synchronous>, transform_indices = @transform_0, window_bounds = array<i64: 128, 128>}, {pipeline_mode = #tpu.pipeline_mode<synchronous>, transform_indices = @transform_1, window_bounds = array<i64: 128, 128>}, {pipeline_mode = #tpu.pipeline_mode<synchronous>, transform_indices = @transform_2, window_bounds = array<i64: 1, 128>}, {pipeline_mode = #tpu.pipeline_mode<synchronous>, transform_indices = @transform_3, window_bounds = array<i64: 1, 128>}, {pipeline_mode = #tpu.pipeline_mode<synchronous>, transform_indices = @transform_4, window_bounds = array<i64: 1, 128>}, {pipeline_mode = #tpu.pipeline_mode<synchronous>, transform_indices = @transform_5, window_bounds = array<i64: 128, 128>}]} {
    %c0 = arith.constant 0 : index
    %c0_0 = arith.constant 0 : index
    %0 = vector.load %arg1[%c0, %c0_0] : memref<128x128xbf16, #tpu.memory_space<vmem>>, vector<128x128xbf16>
    %c0_1 = arith.constant 0 : index
    %c0_2 = arith.constant 0 : index
    %1 = vector.load %arg2[%c0_1, %c0_2] : memref<128x128xbf16, #tpu.memory_space<vmem>>, vector<128x128xbf16>
    %cst = arith.constant dense<0.000000e+00> : vector<128x128xf32>
    %2 = tpu.matmul %0, %1, %cst {dimension_numbers = #tpu.dot_dimension_numbers<[1], [0], [0], [1], [0, 0, 1, 1], [], []>} : vector<128x128xbf16>, vector<128x128xbf16>, vector<128x128xf32> -> vector<128x128xf32>
    %c0_3 = arith.constant 0 : index
    %c0_4 = arith.constant 0 : index
    %3 = vector.load %arg3[%c0_3, %c0_4] : memref<1x128xf32, #tpu.memory_space<vmem>>, vector<1x128xf32>
    %4 = vector.broadcast %3 : vector<1x128xf32> to vector<128x128xf32>
    %5 = arith.addf %2, %4 : vector<128x128xf32>
    %cst_5 = arith.constant dense<0.000000e+00> : vector<128xf32>
    %6 = vector.multi_reduction <add>, %5, %cst_5 [0] : vector<128x128xf32> to vector<128xf32>
    %7 = vector.shape_cast %6 : vector<128xf32> to vector<1x128xf32>
    %cst_6 = arith.constant 7.812500e-03 : f32
    %8 = vector.broadcast %cst_6 : f32 to vector<1x128xf32>
    %9 = arith.mulf %7, %8 : vector<1x128xf32>
    %10 = vector.broadcast %9 : vector<1x128xf32> to vector<128x128xf32>
    %11 = arith.subf %5, %10 : vector<128x128xf32>
    %12 = arith.mulf %11, %11 : vector<128x128xf32>
    %cst_7 = arith.constant dense<0.000000e+00> : vector<128xf32>
    %13 = vector.multi_reduction <add>, %12, %cst_7 [0] : vector<128x128xf32> to vector<128xf32>
    %14 = vector.shape_cast %13 : vector<128xf32> to vector<1x128xf32>
    %cst_8 = arith.constant 7.812500e-03 : f32
    %15 = vector.broadcast %cst_8 : f32 to vector<1x128xf32>
    %16 = arith.mulf %14, %15 : vector<1x128xf32>
    %c0_9 = arith.constant 0 : index
    %c0_10 = arith.constant 0 : index
    %17 = vector.load %arg4[%c0_9, %c0_10] : memref<1x128xf32, #tpu.memory_space<vmem>>, vector<1x128xf32>
    %cst_11 = arith.constant 9.99999974E-6 : f32
    %18 = vector.broadcast %cst_11 : f32 to vector<1x128xf32>
    %19 = arith.addf %16, %18 : vector<1x128xf32>
    %20 = math.rsqrt %19 : vector<1x128xf32>
    %21 = arith.mulf %17, %20 : vector<1x128xf32>
    %c0_12 = arith.constant 0 : index
    %c0_13 = arith.constant 0 : index
    %22 = vector.load %arg5[%c0_12, %c0_13] : memref<1x128xf32, #tpu.memory_space<vmem>>, vector<1x128xf32>
    %23 = arith.mulf %9, %21 : vector<1x128xf32>
    %24 = arith.subf %22, %23 : vector<1x128xf32>
    %25 = vector.broadcast %21 : vector<1x128xf32> to vector<128x128xf32>
    %26 = arith.mulf %5, %25 : vector<128x128xf32>
    %27 = vector.broadcast %24 : vector<1x128xf32> to vector<128x128xf32>
    %28 = arith.addf %26, %27 : vector<128x128xf32>
    %c0_14 = arith.constant 0 : index
    %c0_15 = arith.constant 0 : index
    %29 = vector.load %arg6[%c0_14, %c0_15] : memref<128x128xf32, #tpu.memory_space<vmem>>, vector<128x128xf32>
    tpu.vector_store %arg6[%c0_14, %c0_15], %28 {strides = array<i32>} : memref<128x128xf32, #tpu.memory_space<vmem>>, vector<128x128xf32>,
    return
  }
  func.func @transform_0(%arg0: i32) -> (i32, i32) {
    %c0_i32 = arith.constant 0 : i32
    %c0_i32_0 = arith.constant 0 : i32
    %c0_i32_1 = arith.constant 0 : i32
    return %c0_i32, %c0_i32_0 : i32, i32
  }
  func.func @transform_1(%arg0: i32) -> (i32, i32) {
    %c0_i32 = arith.constant 0 : i32
    %c0_i32_0 = arith.constant 0 : i32
    %c0_i32_1 = arith.constant 0 : i32
    return %c0_i32, %c0_i32_0 : i32, i32
  }
  func.func @transform_2(%arg0: i32) -> (i32, i32) {
    %c0_i32 = arith.constant 0 : i32
    %c0_i32_0 = arith.constant 0 : i32
    %c0_i32_1 = arith.constant 0 : i32
    return %c0_i32, %c0_i32_0 : i32, i32
  }
  func.func @transform_3(%arg0: i32) -> (i32, i32) {
    %c0_i32 = arith.constant 0 : i32
    %c0_i32_0 = arith.constant 0 : i32
    %c0_i32_1 = arith.constant 0 : i32
    return %c0_i32, %c0_i32_0 : i32, i32
  }
  func.func @transform_4(%arg0: i32) -> (i32, i32) {
    %c0_i32 = arith.constant 0 : i32
    %c0_i32_0 = arith.constant 0 : i32
    %c0_i32_1 = arith.constant 0 : i32
    return %c0_i32, %c0_i32_0 : i32, i32
  }
  func.func @transform_5(%arg0: i32) -> (i32, i32) {
    %c0_i32 = arith.constant 0 : i32
    %c0_i32_0 = arith.constant 0 : i32
    %c0_i32_1 = arith.constant 0 : i32
    return %c0_i32, %c0_i32_0 : i32, i32
  }
}

module attributes {stable_mosaic.version = 11 : i64} {
  func.func @_res_block_kernel(%arg0: i32, %arg1: memref<64x384xbf16, #tpu.memory_space<vmem>>, %arg2: memref<384x128xbf16, #tpu.memory_space<vmem>>, %arg3: memref<128x128xbf16, #tpu.memory_space<vmem>>, %arg4: memref<64x128xf32, #tpu.memory_space<vmem>>, %arg5: memref<64x128xf32, #tpu.memory_space<vmem>>) attributes {dimension_semantics = [#tpu.dimension_semantics<parallel>], iteration_bounds = array<i64: 2>, scalar_prefetch = 0 : i64, scratch_operands = 0 : i64, tpu.core_type = #tpu.core_type<tc>, window_params = [{transform_indices = @transform_0, window_bounds = array<i64: 64, 384>}, {pipeline_mode = #tpu.pipeline_mode<synchronous>, transform_indices = @transform_1, window_bounds = array<i64: 384, 128>}, {pipeline_mode = #tpu.pipeline_mode<synchronous>, transform_indices = @transform_2, window_bounds = array<i64: 128, 128>}, {transform_indices = @transform_3, window_bounds = array<i64: 64, 128>}, {transform_indices = @transform_4, window_bounds = array<i64: 64, 128>}]} {
    %c0 = arith.constant 0 : index
    %c0_0 = arith.constant 0 : index
    %0 = vector.load %arg1[%c0, %c0_0] : memref<64x384xbf16, #tpu.memory_space<vmem>>, vector<64x384xbf16>
    %cst = arith.constant 0.000000e+00 : bf16
    %1 = vector.broadcast %cst : bf16 to vector<64x384xbf16>
    %2 = arith.maximumf %0, %1 : vector<64x384xbf16>
    %c0_1 = arith.constant 0 : index
    %c0_2 = arith.constant 0 : index
    %3 = vector.load %arg2[%c0_1, %c0_2] : memref<384x128xbf16, #tpu.memory_space<vmem>>, vector<384x128xbf16>
    %cst_3 = arith.constant dense<0.000000e+00> : vector<64x128xf32>
    %4 = tpu.matmul %2, %3, %cst_3 {dimension_numbers = #tpu.dot_dimension_numbers<[1], [0], [0], [1], [0, 0, 1, 1], [], []>} : vector<64x384xbf16>, vector<384x128xbf16>, vector<64x128xf32> -> vector<64x128xf32>
    %cst_4 = arith.constant 0.000000e+00 : f32
    %5 = vector.broadcast %cst_4 : f32 to vector<64x128xf32>
    %6 = arith.maximumf %4, %5 : vector<64x128xf32>
    %7 = arith.truncf %6 : vector<64x128xf32> to vector<64x128xbf16>
    %c0_5 = arith.constant 0 : index
    %c0_6 = arith.constant 0 : index
    %8 = vector.load %arg3[%c0_5, %c0_6] : memref<128x128xbf16, #tpu.memory_space<vmem>>, vector<128x128xbf16>
    %cst_7 = arith.constant dense<0.000000e+00> : vector<64x128xf32>
    %9 = tpu.matmul %7, %8, %cst_7 {dimension_numbers = #tpu.dot_dimension_numbers<[1], [0], [0], [1], [0, 0, 1, 1], [], []>} : vector<64x128xbf16>, vector<128x128xbf16>, vector<64x128xf32> -> vector<64x128xf32>
    %c0_8 = arith.constant 0 : index
    %c0_9 = arith.constant 0 : index
    %10 = vector.load %arg4[%c0_8, %c0_9] : memref<64x128xf32, #tpu.memory_space<vmem>>, vector<64x128xf32>
    %11 = arith.addf %9, %10 : vector<64x128xf32>
    %c0_10 = arith.constant 0 : index
    %c0_11 = arith.constant 0 : index
    %12 = vector.load %arg5[%c0_10, %c0_11] : memref<64x128xf32, #tpu.memory_space<vmem>>, vector<64x128xf32>
    tpu.vector_store %arg5[%c0_10, %c0_11], %11 {strides = array<i32>} : memref<64x128xf32, #tpu.memory_space<vmem>>, vector<64x128xf32>,
    return
  }
  func.func @transform_0(%arg0: i32) -> (i32, i32) {
    %c0_i32 = arith.constant 0 : i32
    %c0_i32_0 = arith.constant 0 : i32
    return %arg0, %c0_i32 : i32, i32
  }
  func.func @transform_1(%arg0: i32) -> (i32, i32) {
    %c0_i32 = arith.constant 0 : i32
    %c0_i32_0 = arith.constant 0 : i32
    %c0_i32_1 = arith.constant 0 : i32
    return %c0_i32, %c0_i32_0 : i32, i32
  }
  func.func @transform_2(%arg0: i32) -> (i32, i32) {
    %c0_i32 = arith.constant 0 : i32
    %c0_i32_0 = arith.constant 0 : i32
    %c0_i32_1 = arith.constant 0 : i32
    return %c0_i32, %c0_i32_0 : i32, i32
  }
  func.func @transform_3(%arg0: i32) -> (i32, i32) {
    %c0_i32 = arith.constant 0 : i32
    %c0_i32_0 = arith.constant 0 : i32
    return %arg0, %c0_i32 : i32, i32
  }
  func.func @transform_4(%arg0: i32) -> (i32, i32) {
    %c0_i32 = arith.constant 0 : i32
    %c0_i32_0 = arith.constant 0 : i32
    return %arg0, %c0_i32 : i32, i32
  }
}

module attributes {stable_mosaic.version = 11 : i64} {
  func.func @_fused_conv_kernel(%arg0: i32, %arg1: memref<128x384xbf16, #tpu.memory_space<vmem>>, %arg2: memref<384x128xbf16, #tpu.memory_space<vmem>>, %arg3: memref<1x128xf32, #tpu.memory_space<vmem>>, %arg4: memref<1x128xf32, #tpu.memory_space<vmem>>, %arg5: memref<1x128xf32, #tpu.memory_space<vmem>>, %arg6: memref<128x128xf32, #tpu.memory_space<vmem>>) attributes {dimension_semantics = [#tpu.dimension_semantics<arbitrary>], iteration_bounds = array<i64: 1>, scalar_prefetch = 0 : i64, scratch_operands = 0 : i64, tpu.core_type = #tpu.core_type<tc>, window_params = [{pipeline_mode = #tpu.pipeline_mode<synchronous>, transform_indices = @transform_0, window_bounds = array<i64: 128, 384>}, {pipeline_mode = #tpu.pipeline_mode<synchronous>, transform_indices = @transform_1, window_bounds = array<i64: 384, 128>}, {pipeline_mode = #tpu.pipeline_mode<synchronous>, transform_indices = @transform_2, window_bounds = array<i64: 1, 128>}, {pipeline_mode = #tpu.pipeline_mode<synchronous>, transform_indices = @transform_3, window_bounds = array<i64: 1, 128>}, {pipeline_mode = #tpu.pipeline_mode<synchronous>, transform_indices = @transform_4, window_bounds = array<i64: 1, 128>}, {pipeline_mode = #tpu.pipeline_mode<synchronous>, transform_indices = @transform_5, window_bounds = array<i64: 128, 128>}]} {
    %c0 = arith.constant 0 : index
    %c0_0 = arith.constant 0 : index
    %0 = vector.load %arg1[%c0, %c0_0] : memref<128x384xbf16, #tpu.memory_space<vmem>>, vector<128x384xbf16>
    %cst = arith.constant 0.000000e+00 : bf16
    %1 = vector.broadcast %cst : bf16 to vector<128x384xbf16>
    %2 = arith.maximumf %0, %1 : vector<128x384xbf16>
    %c0_1 = arith.constant 0 : index
    %c0_2 = arith.constant 0 : index
    %3 = vector.load %arg2[%c0_1, %c0_2] : memref<384x128xbf16, #tpu.memory_space<vmem>>, vector<384x128xbf16>
    %cst_3 = arith.constant dense<0.000000e+00> : vector<128x128xf32>
    %4 = tpu.matmul %2, %3, %cst_3 {dimension_numbers = #tpu.dot_dimension_numbers<[1], [0], [0], [1], [0, 0, 1, 1], [], []>} : vector<128x384xbf16>, vector<384x128xbf16>, vector<128x128xf32> -> vector<128x128xf32>
    %c0_4 = arith.constant 0 : index
    %c0_5 = arith.constant 0 : index
    %5 = vector.load %arg3[%c0_4, %c0_5] : memref<1x128xf32, #tpu.memory_space<vmem>>, vector<1x128xf32>
    %6 = vector.broadcast %5 : vector<1x128xf32> to vector<128x128xf32>
    %7 = arith.addf %4, %6 : vector<128x128xf32>
    %cst_6 = arith.constant dense<0.000000e+00> : vector<128xf32>
    %8 = vector.multi_reduction <add>, %7, %cst_6 [0] : vector<128x128xf32> to vector<128xf32>
    %9 = vector.shape_cast %8 : vector<128xf32> to vector<1x128xf32>
    %c32_i32 = arith.constant 32 : i32
    %10 = tpu.dynamic_rotate %9 by %c32_i32 dim 1 : vector<1x128xf32>, i32 -> vector<1x128xf32>
    %11 = arith.addf %9, %10 : vector<1x128xf32>
    %c64_i32 = arith.constant 64 : i32
    %12 = tpu.dynamic_rotate %9 by %c64_i32 dim 1 : vector<1x128xf32>, i32 -> vector<1x128xf32>
    %13 = arith.addf %11, %12 : vector<1x128xf32>
    %c96_i32 = arith.constant 96 : i32
    %14 = tpu.dynamic_rotate %9 by %c96_i32 dim 1 : vector<1x128xf32>, i32 -> vector<1x128xf32>
    %15 = arith.addf %13, %14 : vector<1x128xf32>
    %cst_7 = arith.constant 0.001953125 : f32
    %16 = vector.broadcast %cst_7 : f32 to vector<1x128xf32>
    %17 = arith.mulf %15, %16 : vector<1x128xf32>
    %18 = vector.broadcast %17 : vector<1x128xf32> to vector<128x128xf32>
    %19 = arith.subf %7, %18 : vector<128x128xf32>
    %20 = arith.mulf %19, %19 : vector<128x128xf32>
    %cst_8 = arith.constant dense<0.000000e+00> : vector<128xf32>
    %21 = vector.multi_reduction <add>, %20, %cst_8 [0] : vector<128x128xf32> to vector<128xf32>
    %22 = vector.shape_cast %21 : vector<128xf32> to vector<1x128xf32>
    %c32_i32_9 = arith.constant 32 : i32
    %23 = tpu.dynamic_rotate %22 by %c32_i32_9 dim 1 : vector<1x128xf32>, i32 -> vector<1x128xf32>
    %24 = arith.addf %22, %23 : vector<1x128xf32>
    %c64_i32_10 = arith.constant 64 : i32
    %25 = tpu.dynamic_rotate %22 by %c64_i32_10 dim 1 : vector<1x128xf32>, i32 -> vector<1x128xf32>
    %26 = arith.addf %24, %25 : vector<1x128xf32>
    %c96_i32_11 = arith.constant 96 : i32
    %27 = tpu.dynamic_rotate %22 by %c96_i32_11 dim 1 : vector<1x128xf32>, i32 -> vector<1x128xf32>
    %28 = arith.addf %26, %27 : vector<1x128xf32>
    %cst_12 = arith.constant 0.001953125 : f32
    %29 = vector.broadcast %cst_12 : f32 to vector<1x128xf32>
    %30 = arith.mulf %28, %29 : vector<1x128xf32>
    %c0_13 = arith.constant 0 : index
    %c0_14 = arith.constant 0 : index
    %31 = vector.load %arg4[%c0_13, %c0_14] : memref<1x128xf32, #tpu.memory_space<vmem>>, vector<1x128xf32>
    %cst_15 = arith.constant 9.99999974E-6 : f32
    %32 = vector.broadcast %cst_15 : f32 to vector<1x128xf32>
    %33 = arith.addf %30, %32 : vector<1x128xf32>
    %34 = math.rsqrt %33 : vector<1x128xf32>
    %35 = arith.mulf %31, %34 : vector<1x128xf32>
    %c0_16 = arith.constant 0 : index
    %c0_17 = arith.constant 0 : index
    %36 = vector.load %arg5[%c0_16, %c0_17] : memref<1x128xf32, #tpu.memory_space<vmem>>, vector<1x128xf32>
    %37 = arith.mulf %17, %35 : vector<1x128xf32>
    %38 = arith.subf %36, %37 : vector<1x128xf32>
    %39 = vector.broadcast %35 : vector<1x128xf32> to vector<128x128xf32>
    %40 = arith.mulf %7, %39 : vector<128x128xf32>
    %41 = vector.broadcast %38 : vector<1x128xf32> to vector<128x128xf32>
    %42 = arith.addf %40, %41 : vector<128x128xf32>
    %cst_18 = arith.constant 0.000000e+00 : f32
    %43 = vector.broadcast %cst_18 : f32 to vector<128x128xf32>
    %44 = arith.maximumf %42, %43 : vector<128x128xf32>
    %c0_19 = arith.constant 0 : index
    %c0_20 = arith.constant 0 : index
    %45 = vector.load %arg6[%c0_19, %c0_20] : memref<128x128xf32, #tpu.memory_space<vmem>>, vector<128x128xf32>
    tpu.vector_store %arg6[%c0_19, %c0_20], %44 {strides = array<i32>} : memref<128x128xf32, #tpu.memory_space<vmem>>, vector<128x128xf32>,
    return
  }
  func.func @transform_0(%arg0: i32) -> (i32, i32) {
    %c0_i32 = arith.constant 0 : i32
    %c0_i32_0 = arith.constant 0 : i32
    %c0_i32_1 = arith.constant 0 : i32
    return %c0_i32, %c0_i32_0 : i32, i32
  }
  func.func @transform_1(%arg0: i32) -> (i32, i32) {
    %c0_i32 = arith.constant 0 : i32
    %c0_i32_0 = arith.constant 0 : i32
    %c0_i32_1 = arith.constant 0 : i32
    return %c0_i32, %c0_i32_0 : i32, i32
  }
  func.func @transform_2(%arg0: i32) -> (i32, i32) {
    %c0_i32 = arith.constant 0 : i32
    %c0_i32_0 = arith.constant 0 : i32
    %c0_i32_1 = arith.constant 0 : i32
    return %c0_i32, %c0_i32_0 : i32, i32
  }
  func.func @transform_3(%arg0: i32) -> (i32, i32) {
    %c0_i32 = arith.constant 0 : i32
    %c0_i32_0 = arith.constant 0 : i32
    %c0_i32_1 = arith.constant 0 : i32
    return %c0_i32, %c0_i32_0 : i32, i32
  }
  func.func @transform_4(%arg0: i32) -> (i32, i32) {
    %c0_i32 = arith.constant 0 : i32
    %c0_i32_0 = arith.constant 0 : i32
    %c0_i32_1 = arith.constant 0 : i32
    return %c0_i32, %c0_i32_0 : i32, i32
  }
  func.func @transform_5(%arg0: i32) -> (i32, i32) {
    %c0_i32 = arith.constant 0 : i32
    %c0_i32_0 = arith.constant 0 : i32
    %c0_i32_1 = arith.constant 0 : i32
    return %c0_i32, %c0_i32_0 : i32, i32
  }
}

module attributes {stable_mosaic.version = 11 : i64} {
  func.func @_fused_conv_kernel(%arg0: i32, %arg1: memref<256x256xbf16, #tpu.memory_space<vmem>>, %arg2: memref<256x128xbf16, #tpu.memory_space<vmem>>, %arg3: memref<1x128xf32, #tpu.memory_space<vmem>>, %arg4: memref<256x128xf32, #tpu.memory_space<vmem>>) attributes {dimension_semantics = [#tpu.dimension_semantics<parallel>], iteration_bounds = array<i64: 2>, scalar_prefetch = 0 : i64, scratch_operands = 0 : i64, tpu.core_type = #tpu.core_type<tc>, window_params = [{transform_indices = @transform_0, window_bounds = array<i64: 256, 256>}, {pipeline_mode = #tpu.pipeline_mode<synchronous>, transform_indices = @transform_1, window_bounds = array<i64: 256, 128>}, {pipeline_mode = #tpu.pipeline_mode<synchronous>, transform_indices = @transform_2, window_bounds = array<i64: 1, 128>}, {transform_indices = @transform_3, window_bounds = array<i64: 256, 128>}]} {
    %c0 = arith.constant 0 : index
    %c0_0 = arith.constant 0 : index
    %0 = vector.load %arg1[%c0, %c0_0] : memref<256x256xbf16, #tpu.memory_space<vmem>>, vector<256x256xbf16>
    %c0_1 = arith.constant 0 : index
    %c0_2 = arith.constant 0 : index
    %1 = vector.load %arg2[%c0_1, %c0_2] : memref<256x128xbf16, #tpu.memory_space<vmem>>, vector<256x128xbf16>
    %cst = arith.constant dense<0.000000e+00> : vector<256x128xf32>
    %2 = tpu.matmul %0, %1, %cst {dimension_numbers = #tpu.dot_dimension_numbers<[1], [0], [0], [1], [0, 0, 1, 1], [], []>} : vector<256x256xbf16>, vector<256x128xbf16>, vector<256x128xf32> -> vector<256x128xf32>
    %c0_3 = arith.constant 0 : index
    %c0_4 = arith.constant 0 : index
    %3 = vector.load %arg3[%c0_3, %c0_4] : memref<1x128xf32, #tpu.memory_space<vmem>>, vector<1x128xf32>
    %4 = vector.broadcast %3 : vector<1x128xf32> to vector<256x128xf32>
    %5 = arith.addf %2, %4 : vector<256x128xf32>
    %c0_5 = arith.constant 0 : index
    %c0_6 = arith.constant 0 : index
    %6 = vector.load %arg4[%c0_5, %c0_6] : memref<256x128xf32, #tpu.memory_space<vmem>>, vector<256x128xf32>
    tpu.vector_store %arg4[%c0_5, %c0_6], %5 {strides = array<i32>} : memref<256x128xf32, #tpu.memory_space<vmem>>, vector<256x128xf32>,
    return
  }
  func.func @transform_0(%arg0: i32) -> (i32, i32) {
    %c0_i32 = arith.constant 0 : i32
    %c0_i32_0 = arith.constant 0 : i32
    return %arg0, %c0_i32 : i32, i32
  }
  func.func @transform_1(%arg0: i32) -> (i32, i32) {
    %c0_i32 = arith.constant 0 : i32
    %c0_i32_0 = arith.constant 0 : i32
    %c0_i32_1 = arith.constant 0 : i32
    return %c0_i32, %c0_i32_0 : i32, i32
  }
  func.func @transform_2(%arg0: i32) -> (i32, i32) {
    %c0_i32 = arith.constant 0 : i32
    %c0_i32_0 = arith.constant 0 : i32
    %c0_i32_1 = arith.constant 0 : i32
    return %c0_i32, %c0_i32_0 : i32, i32
  }
  func.func @transform_3(%arg0: i32) -> (i32, i32) {
    %c0_i32 = arith.constant 0 : i32
    %c0_i32_0 = arith.constant 0 : i32
    return %arg0, %c0_i32 : i32, i32
  }
}

</mosaic_0001>

<bundles_post_ra>
// kernel: tile.31
= control target key start
LH: loop header
LB: loop body
LE: loop exit
PB: predicated region body
PF: predicated region fallthrough
CT: control target
= control target key end

     0   :  { %s22_s0 = inlined_call_operand.vmem [shape: f32[32], index: 0, kind: input, shape index: {}]   ;;  %s23_s1 = inlined_call_operand.vmem [shape: f32[4,32], index: 1, kind: output, shape index: {}]  }
   0x1   :  { %v4_v0 = vld [vmem:[%s22_s0] ss:$0 sm:$0xff] }
   0x2   :  { %5 = vst [vmem:[%s23_s1] sm:$0xf] %v4_v0 }

// kernel: tile.34
= control target key start
LH: loop header
LB: loop body
LE: loop exit
PB: predicated region body
PF: predicated region fallthrough
CT: control target
= control target key end

     0   :  { %vm7_vm0 = vcmask 261120   ;;  %s37_s8 = smov 32   ;;  %s38_s9 = smov 64   ;;  %vm13_vm1 = vcmask 1048320   ;;  %vm19_vm2 = vcmask 785920   ;;  %vm25_vm3 = vcmask 523520   ;;  %s55_s0 = inlined_call_operand.vmem [shape: f32[4,32], index: 0, kind: input, shape index: {}]   ;;  %s56_s1 = inlined_call_operand.vmem [shape: f32[1,128], index: 1, kind: output, shape index: {}]  }
   0x1   :  { %v4_v0 = vld [vmem:[%s55_s0] sm:$0xf]  ;;  %s36_s0 = smov 96  }
   0x2   :  { %5 = vst [vmem:[#allocation1] sm:$0xf] %v4_v0 }
   0x9   :  { %v10_v1 = vld [vmem:[#allocation1 + $0x3] sm:$0x1]   ;;  %v22_v2 = vld [vmem:[#allocation1 + $0x1] sm:$0x1]   ;;  %v6_v3 = vld [vmem:[#allocation1] sm:$0x1]  }
   0xa   :  { %11 = vrot.lane.b32.xlu0 %v10_v1, %s36_s0  ;;  %23 = vrot.lane.b32.xlu1 %v22_v2, %s37_s8  ;;  %v16_v4 = vld [vmem:[#allocation1 + $0x2] sm:$0x1]   ;;  %8 = vst.msk [vmem:[#allocation0] sm:$0x1] %vm7_vm0, %v6_v3  }
   0xe   :  { %17 = vrot.lane.b32.xlu0 %v16_v4, %s38_s9 }
  0x7c   :  { %v12_v5 = vpop.permute.xlu0 %11   ;;  %v24_v6 = vpop.permute.xlu1 %23  }
  0x7d   :  { %14 = vst.msk [vmem:[#allocation0] sm:$0x1] %vm13_vm1, %v12_v5  }
  0x80   :  { %v18_v7 = vpop.permute.xlu0 %17  }
  0x81   :  { %20 = vst.msk [vmem:[#allocation0] sm:$0x1] %vm19_vm2, %v18_v7  }
  0x82   :  { %26 = vst.msk [vmem:[#allocation0] sm:$0x1] %vm25_vm3, %v24_v6  }
  0x89   :  { %v30_v8 = vld [vmem:[#allocation0] sm:$0x1] }
  0x8a   :  { %32 = vst [vmem:[%s56_s1] sm:$0x1] %v30_v8 }

// kernel: decoder_forward.5
= control target key start
LH: loop header
LB: loop body
LE: loop exit
PB: predicated region body
PF: predicated region fallthrough
CT: control target
= control target key end

     0   :  { %s733_s1 = inlined_call_operand.vmem [shape: bf16[128,128], index: 1, kind: input, shape index: {}]   ;;  %s734_s0 = inlined_call_operand.vmem [shape: bf16[128,128], index: 0, kind: input, shape index: {}]   ;;  %s735_s2 = inlined_call_operand.vmem [shape: f32[1,128], index: 2, kind: input, shape index: {}]   ;;  %s736_s3 = inlined_call_operand.vmem [shape: f32[1,128], index: 3, kind: input, shape index: {}]   ;;  %s737_s4 = inlined_call_operand.vmem [shape: f32[1,128], index: 4, kind: input, shape index: {}]   ;;  %s738_s5 = inlined_call_operand.vmem [shape: f32[128,128], index: 5, kind: output, shape index: {}]  }
   0x1   :  { %v481_v0 = vld [vmem:[%s733_s1] sm:$0xff]   ;;  %v482_v1 = vld [vmem:[%s733_s1 + $0x8] sm:$0xff]   ;;  %v483_v2 = vld [vmem:[%s733_s1 + $0x10] sm:$0xff]  }
   0x2   :  { %433 = vmatprep.subr.bf16.mxu0 %v481_v0  ;;  %465 = vmatprep.subr.bf16.mxu1 %v481_v0  ;;  %v484_v3 = vld [vmem:[%s733_s1 + $0x18] sm:$0xff]   ;;  %v489_v4 = vld [vmem:[%s734_s0] sm:$0xff]   ;;  %v486_v7 = vld [vmem:[%s733_s1 + $0x28] sm:$0xff]  }
   0x3   :  { %434 = vmatpush3.bf16.msra.mxu0 %v481_v0  ;;  %473 = vmatpush3.bf16.msra.mxu1 %v481_v0  ;;  %v485_v5 = vld [vmem:[%s733_s1 + $0x20] sm:$0xff]   ;;  %v487_v8 = vld [vmem:[%s733_s1 + $0x30] sm:$0xff]   ;;  %v488_v9 = vld [vmem:[%s733_s1 + $0x38] sm:$0xff]  }
   0x4   :  { %435 = vmatprep.subr.bf16.mxu0 %v482_v1  ;;  %466 = vmatprep.subr.bf16.mxu1 %v482_v1  ;;  %v493_v6 = vld [vmem:[%s734_s0 + $0x20] sm:$0xff]   ;;  %v490_v10 = vld [vmem:[%s734_s0 + $0x8] sm:$0xff]   ;;  %v491_v12 = vld [vmem:[%s734_s0 + $0x10] sm:$0xff]  }
   0x5   :  { %449 = vmatprep.mubr.bf16.mxu0 %v489_v4  ;;  %457 = vmatprep.mubr.bf16.mxu1 %v493_v6  ;;  %v494_v11 = vld [vmem:[%s734_s0 + $0x28] sm:$0xff]   ;;  %v495_v13 = vld [vmem:[%s734_s0 + $0x30] sm:$0xff]   ;;  %v492_v14 = vld [vmem:[%s734_s0 + $0x18] sm:$0xff]  }
   0x6   :  { %v496_v15 = vld [vmem:[%s734_s0 + $0x38] sm:$0xff]   ;;  %v400_v18 = vld [vmem:[%s735_s2] ss:$0 sm:$0xff] }
   0x7   :  { %436 = vmatpush3.bf16.msra.mxu0 %v482_v1  ;;  %474 = vmatpush3.bf16.msra.mxu1 %v482_v1 }
   0x8   :  { %437 = vmatprep.subr.bf16.mxu0 %v483_v2  ;;  %467 = vmatprep.subr.bf16.mxu1 %v483_v2 }
   0xb   :  { %438 = vmatpush3.bf16.msra.mxu0 %v483_v2  ;;  %475 = vmatpush3.bf16.msra.mxu1 %v483_v2 }
   0xc   :  { %439 = vmatprep.subr.bf16.mxu0 %v484_v3  ;;  %468 = vmatprep.subr.bf16.mxu1 %v484_v3 }
   0xf   :  { %440 = vmatpush3.bf16.msra.mxu0 %v484_v3  ;;  %476 = vmatpush3.bf16.msra.mxu1 %v484_v3 }
  0x10   :  { %441 = vmatprep.subr.bf16.mxu0 %v485_v5  ;;  %469 = vmatprep.subr.bf16.mxu1 %v485_v5 }
  0x13   :  { %442 = vmatpush3.bf16.msra.mxu0 %v485_v5  ;;  %477 = vmatpush3.bf16.msra.mxu1 %v485_v5 }
  0x14   :  { %443 = vmatprep.subr.bf16.mxu0 %v486_v7  ;;  %470 = vmatprep.subr.bf16.mxu1 %v486_v7 }
  0x17   :  { %444 = vmatpush3.bf16.msra.mxu0 %v486_v7  ;;  %478 = vmatpush3.bf16.msra.mxu1 %v486_v7 }
  0x18   :  { %445 = vmatprep.subr.bf16.mxu0 %v487_v8  ;;  %471 = vmatprep.subr.bf16.mxu1 %v487_v8 }
  0x1b   :  { %446 = vmatpush3.bf16.msra.mxu0 %v487_v8  ;;  %479 = vmatpush3.bf16.msra.mxu1 %v487_v8 }
  0x1c   :  { %447 = vmatprep.subr.bf16.mxu0 %v488_v9  ;;  %472 = vmatprep.subr.bf16.mxu1 %v488_v9 }
  0x1f   :  { %448 = vmatpush3.bf16.msra.mxu0 %v488_v9  ;;  %480 = vmatpush3.bf16.msra.mxu1 %v488_v9 }
  0x22   :  { %450 = vmatmul.mubr.bf16.vlgmr.msra.gmra.mrb[0].mxu0 %v490_v10  ;;  %458 = vmatmul.mubr.bf16.vlgmr.msra.gmra.mrb[0].mxu1 %v494_v11 }
  0x23   :  { %453 = vmatprep.mubr.bf16.mxu0 %v491_v12  ;;  %461 = vmatprep.mubr.bf16.mxu1 %v495_v13 }
  0x2a   :  { %454 = vmatmul.mubr.bf16.gmra.mrb[4].mxu0 %v492_v14  ;;  %462 = vmatmul.mubr.bf16.gmra.mrb[4].mxu1 %v496_v15 }
  0xf5   :  { %v451_v16 = vpop.f32.mrb[0].mxu0  ;;  %v459_v17 = vpop.f32.mrb[0].mxu1 }
  0xf6   :  { %v190_v19 = vpop.f32.mrb[1].mxu0  ;;  %v222_v20 = vpop.f32.mrb[1].mxu1  ;;  %v584_v27 = vadd.f32 %v451_v16, %v400_v18  ;;  %v609_v51 = vadd.f32 %v459_v17, %v400_v18 }
  0xf7   :  { %v452_v21 = vpop.f32.mrb[2].mxu0  ;;  %v460_v22 = vpop.f32.mrb[2].mxu1  ;;  %v580_v25 = vadd.f32 %v400_v18, %v190_v19  ;;  %v603_v47 = vadd.f32 %v400_v18, %v222_v20 }
  0xf8   :  { %v193_v23 = vpop.f32.mrb[3].mxu0  ;;  %v225_v24 = vpop.f32.mrb[3].mxu1  ;;  %v588_v29 = vadd.f32 %v452_v21, %v400_v18  ;;  %v612_v53 = vadd.f32 %v460_v22, %v400_v18 }
  0xf9   :  { %v582_v26 = vadd.f32 %v400_v18, %v193_v23  ;;  %v607_v50 = vadd.f32 %v400_v18, %v225_v24 }
  0xfb   :  { %v253_v28 = vadd.f32 %v582_v26, %v580_v25 }
  0xfd   :  { %v254_v30 = vadd.f32 %v253_v28, %v584_v27  ;;  %v455_v31 = vpop.f32.mrb[4].mxu0  ;;  %v463_v32 = vpop.f32.mrb[4].mxu1 }
  0xfe   :  { %v206_v33 = vpop.f32.mrb[5].mxu0  ;;  %v238_v34 = vpop.f32.mrb[5].mxu1  ;;  %v597_v43 = vadd.f32 %v455_v31, %v400_v18  ;;  %v621_v59 = vadd.f32 %v463_v32, %v400_v18 }
  0xff   :  { %v591_v35 = vadd.f32 %v400_v18, %v206_v33  ;;  %v255_v36 = vadd.f32 %v254_v30, %v588_v29  ;;  %v456_v37 = vpop.f32.mrb[6].mxu0  ;;  %v464_v38 = vpop.f32.mrb[6].mxu1  ;;  %v615_v55 = vadd.f32 %v400_v18, %v238_v34 }
 0x100   :  { %v209_v39 = vpop.f32.mrb[7].mxu0  ;;  %v241_v40 = vpop.f32.mrb[7].mxu1  ;;  %v600_v45 = vadd.f32 %v456_v37, %v400_v18  ;;  %v624_v61 = vadd.f32 %v464_v38, %v400_v18 }
 0x101   :  { %v256_v41 = vadd.f32 %v255_v36, %v591_v35  ;;  %v595_v42 = vadd.f32 %v400_v18, %v209_v39  ;;  %v619_v58 = vadd.f32 %v400_v18, %v241_v40 }
 0x103   :  { %v257_v44 = vadd.f32 %v256_v41, %v595_v42 }
 0x105   :  { %v258_v46 = vadd.f32 %v257_v44, %v597_v43 }
 0x107   :  { %v259_v48 = vadd.f32 %v258_v46, %v600_v45 }
 0x109   :  { %v260_v49 = vadd.f32 %v259_v48, %v603_v47 }
 0x10b   :  { %v261_v52 = vadd.f32 %v260_v49, %v607_v50 }
 0x10d   :  { %v262_v54 = vadd.f32 %v261_v52, %v609_v51 }
 0x10f   :  { %v263_v56 = vadd.f32 %v262_v54, %v612_v53 }
 0x111   :  { %v264_v57 = vadd.f32 %v263_v56, %v615_v55 }
 0x113   :  { %v265_v60 = vadd.f32 %v264_v57, %v619_v58 }
 0x115   :  { %v266_v62 = vadd.f32 %v265_v60, %v621_v59 }
 0x117   :  { %v267_v63 = vadd.f32 %v266_v62, %v624_v61 }
 0x119   :  { %v268_v0 = vrot.slane %v267_v63, 4 }
 0x11b   :  { %v269_v1 = vadd.f32 %v268_v0, %v267_v63 }
 0x11d   :  { %v270_v2 = vrot.slane %v269_v1, 2 }
 0x11f   :  { %v271_v3 = vadd.f32 %v270_v2, %v269_v1 }
 0x121   :  { %v272_v4 = vrot.slane %v271_v3, 1 }
 0x123   :  { %v273_v5 = vadd.f32 %v272_v4, %v271_v3 }
 0x125   :  { %v628_v6 = vmul.f32 0.0078125, %v273_v5 }
 0x127   :  { %v275_v7 = vsub.f32 %v580_v25, %v628_v6  ;;  %v276_v8 = vsub.f32 %v582_v26, %v628_v6  ;;  %v277_v9 = vsub.f32 %v584_v27, %v628_v6  ;;  %v278_v12 = vsub.f32 %v588_v29, %v628_v6 }
 0x128   :  { %v279_v13 = vsub.f32 %v591_v35, %v628_v6  ;;  %v280_v16 = vsub.f32 %v595_v42, %v628_v6  ;;  %v281_v19 = vsub.f32 %v597_v43, %v628_v6  ;;  %v282_v22 = vsub.f32 %v600_v45, %v628_v6 }
 0x129   :  { %v291_v10 = vmul.f32 %v275_v7, %v275_v7  ;;  %v292_v11 = vmul.f32 %v276_v8, %v276_v8  ;;  %v293_v14 = vmul.f32 %v277_v9, %v277_v9  ;;  %v294_v17 = vmul.f32 %v278_v12, %v278_v12 }
 0x12a   :  { %v295_v20 = vmul.f32 %v279_v13, %v279_v13  ;;  %v296_v23 = vmul.f32 %v280_v16, %v280_v16  ;;  %v283_v28 = vsub.f32 %v603_v47, %v628_v6  ;;  %v297_v30 = vmul.f32 %v281_v19, %v281_v19 }
 0x12b   :  { %v307_v15 = vadd.f32 %v292_v11, %v291_v10  ;;  %v284_v32 = vsub.f32 %v607_v50, %v628_v6  ;;  %v298_v33 = vmul.f32 %v282_v22, %v282_v22  ;;  %v285_v36 = vsub.f32 %v609_v51, %v628_v6 }
 0x12c   :  { %v299_v37 = vmul.f32 %v283_v28, %v283_v28  ;;  %v286_v39 = vsub.f32 %v612_v53, %v628_v6  ;;  %v287_v44 = vsub.f32 %v615_v55, %v628_v6  ;;  %v288_v49 = vsub.f32 %v619_v58, %v628_v6 }
 0x12d   :  { %v308_v18 = vadd.f32 %v307_v15, %v293_v14  ;;  %v300_v40 = vmul.f32 %v284_v32, %v284_v32  ;;  %v301_v46 = vmul.f32 %v285_v36, %v285_v36  ;;  %v289_v56 = vsub.f32 %v621_v59, %v628_v6 }
 0x12e   :  { %v302_v52 = vmul.f32 %v286_v39, %v286_v39  ;;  %v303_v57 = vmul.f32 %v287_v44, %v287_v44  ;;  %v290_v62 = vsub.f32 %v624_v61, %v628_v6  ;;  %v304_v63 = vmul.f32 %v288_v49, %v288_v49 }
 0x12f   :  { %v309_v21 = vadd.f32 %v308_v18, %v294_v17  ;;  %v305_v1 = vmul.f32 %v289_v56, %v289_v56  ;;  %v337_v15 = vlaneseq  ;;  %v329_v17 = vld [vmem:[%s736_s3] sm:$0x1] }
 0x130   :  { %v306_v3 = vmul.f32 %v290_v62, %v290_v62 }
 0x131   :  { %v310_v24 = vadd.f32 %v309_v21, %v295_v20  ;;  %v338_v16 = vshrl.u32 %v337_v15, 7  ;;  %v333_v21 = vld [vmem:[%s737_s4] sm:$0x1] }
 0x133   :  { %v311_v31 = vadd.f32 %v310_v24, %v296_v23  ;;  %v339_v18 = vsub.s32 0, %v338_v16 }
 0x135   :  { %v312_v34 = vadd.f32 %v311_v31, %v297_v30 }
 0x137   :  { %v313_v38 = vadd.f32 %v312_v34, %v298_v33 }
 0x139   :  { %v314_v41 = vadd.f32 %v313_v38, %v299_v37 }
 0x13b   :  { %v315_v48 = vadd.f32 %v314_v41, %v300_v40 }
 0x13d   :  { %v316_v54 = vadd.f32 %v315_v48, %v301_v46 }
 0x13f   :  { %v317_v60 = vadd.f32 %v316_v54, %v302_v52 }
 0x141   :  { %v318_v0 = vadd.f32 %v317_v60, %v303_v57 }
 0x143   :  { %v319_v2 = vadd.f32 %v318_v0, %v304_v63 }
 0x145   :  { %v320_v4 = vadd.f32 %v319_v2, %v305_v1 }
 0x147   :  { %v321_v5 = vadd.f32 %v320_v4, %v306_v3 }
 0x149   :  { %v322_v7 = vrot.slane %v321_v5, 4 }
 0x14b   :  { %v323_v8 = vadd.f32 %v322_v7, %v321_v5 }
 0x14d   :  { %v324_v9 = vrot.slane %v323_v8, 2 }
 0x14f   :  { %v325_v10 = vadd.f32 %v324_v9, %v323_v8 }
 0x151   :  { %v326_v11 = vrot.slane %v325_v10, 1 }
 0x153   :  { %v327_v12 = vadd.f32 %v326_v11, %v325_v10 }
 0x155   :  { %v328_v13 = vmul.f32 0.0078125, %v327_v12 }
 0x157   :  { %v330_v14 = vadd.f32 1e-05, %v328_v13 }
 0x159   :  { %497 = vrsqrt.f32 %v330_v14 }
 0x163   :  { %v498_v19 = vpop.eup %497 }
 0x164   :  { %v332_v20 = vmul.f32 %v498_v19, %v329_v17 }
 0x166   :  { %v334_v22 = vmul.f32 %v332_v20, %v628_v6  ;;  %v340_v23 = vrot.slane %v332_v20, %v339_v18 }
 0x168   :  { %v335_v24 = vsub.f32 %v333_v21, %v334_v22  ;;  %v342_v28 = vmul.f32 %v340_v23, %v580_v25  ;;  %v343_v30 = vmul.f32 %v340_v23, %v582_v26  ;;  %v344_v31 = vmul.f32 %v340_v23, %v584_v27 }
 0x169   :  { %v345_v32 = vmul.f32 %v340_v23, %v588_v29  ;;  %v346_v33 = vmul.f32 %v340_v23, %v591_v35  ;;  %v347_v34 = vmul.f32 %v340_v23, %v595_v42  ;;  %v348_v36 = vmul.f32 %v340_v23, %v597_v43 }
 0x16a   :  { %v349_v37 = vmul.f32 %v340_v23, %v600_v45  ;;  %v350_v6 = vmul.f32 %v340_v23, %v603_v47  ;;  %v351_v38 = vmul.f32 %v340_v23, %v607_v50  ;;  %v352_v25 = vmul.f32 %v340_v23, %v609_v51 }
 0x16b   :  { %v353_v26 = vmul.f32 %v340_v23, %v612_v53  ;;  %v362_v39 = vrot.slane %v335_v24, %v339_v18  ;;  %v354_v27 = vmul.f32 %v340_v23, %v615_v55  ;;  %v355_v29 = vmul.f32 %v340_v23, %v619_v58 }
 0x16c   :  { %v356_v35 = vmul.f32 %v340_v23, %v621_v59  ;;  %v357_v42 = vmul.f32 %v340_v23, %v624_v61 }
 0x16d   :  { %v364_v43 = vadd.f32 %v362_v39, %v342_v28  ;;  %v365_v40 = vadd.f32 %v362_v39, %v343_v30  ;;  %v366_v45 = vadd.f32 %v362_v39, %v344_v31  ;;  %v367_v41 = vadd.f32 %v362_v39, %v345_v32 }
 0x16e   :  { %v368_v47 = vadd.f32 %v362_v39, %v346_v33  ;;  %v369_v44 = vadd.f32 %v362_v39, %v347_v34  ;;  %v370_v50 = vadd.f32 %v362_v39, %v348_v36  ;;  %v371_v46 = vadd.f32 %v362_v39, %v349_v37 }
 0x16f   :  { %v372_v51 = vadd.f32 %v362_v39, %v350_v6  ;;  %v373_v48 = vadd.f32 %v362_v39, %v351_v38  ;;  %v374_v53 = vadd.f32 %v362_v39, %v352_v25  ;;  %v375_v49 = vadd.f32 %v362_v39, %v353_v26  ;;  %380 = vst [vmem:[%s738_s5] sm:$0xff] %v364_v43 }
 0x170   :  { %381 = vst [vmem:[%s738_s5 + $0x8] sm:$0xff] %v365_v40  ;;  %382 = vst [vmem:[%s738_s5 + $0x10] sm:$0xff] %v366_v45  ;;  %v376_v55 = vadd.f32 %v362_v39, %v354_v27  ;;  %v377_v58 = vadd.f32 %v362_v39, %v355_v29  ;;  %v378_v59 = vadd.f32 %v362_v39, %v356_v35 }
 0x171   :  { %383 = vst [vmem:[%s738_s5 + $0x18] sm:$0xff] %v367_v41  ;;  %v379_v61 = vadd.f32 %v362_v39, %v357_v42  ;;  %384 = vst [vmem:[%s738_s5 + $0x20] sm:$0xff] %v368_v47 }
 0x172   :  { %385 = vst [vmem:[%s738_s5 + $0x28] sm:$0xff] %v369_v44  ;;  %386 = vst [vmem:[%s738_s5 + $0x30] sm:$0xff] %v370_v50 }
 0x173   :  { %387 = vst [vmem:[%s738_s5 + $0x38] sm:$0xff] %v371_v46  ;;  %388 = vst [vmem:[%s738_s5 + $0x40] sm:$0xff] %v372_v51 }
 0x174   :  { %389 = vst [vmem:[%s738_s5 + $0x48] sm:$0xff] %v373_v48  ;;  %390 = vst [vmem:[%s738_s5 + $0x50] sm:$0xff] %v374_v53 }
 0x175   :  { %391 = vst [vmem:[%s738_s5 + $0x58] sm:$0xff] %v375_v49  ;;  %392 = vst [vmem:[%s738_s5 + $0x60] sm:$0xff] %v376_v55 }
 0x176   :  { %393 = vst [vmem:[%s738_s5 + $0x68] sm:$0xff] %v377_v58  ;;  %394 = vst [vmem:[%s738_s5 + $0x70] sm:$0xff] %v378_v59 }
 0x177   :  { %395 = vst [vmem:[%s738_s5 + $0x78] sm:$0xff] %v379_v61 }

// kernel: decoder_forward.6
= control target key start
LH: loop header
LB: loop body
LE: loop exit
PB: predicated region body
PF: predicated region fallthrough
CT: control target
= control target key end

     0   :  { %s1131_s15 = smov 0   ;;  %s1285_s0 = inlined_call_operand.vmem [shape: bf16[128,384], index: 0, kind: input, shape index: {}]   ;;  %s1286_s1 = inlined_call_operand.vmem [shape: bf16[384,128], index: 1, kind: input, shape index: {}]   ;;  %s1287_s2 = inlined_call_operand.vmem [shape: bf16[128,128], index: 2, kind: input, shape index: {}]   ;;  %s1288_s3 = inlined_call_operand.vmem [shape: f32[128,128], index: 3, kind: input, shape index: {}]   ;;  %s1289_s4 = inlined_call_operand.vmem [shape: f32[128,128], index: 4, kind: output, shape index: {}]  }
   0x1 LB: > { %s870_s16 = sadd.s32 4294967295, %s1103_s15   ;;  %p874_p0 = scmp.ge.s32.totalorder %s1103_s15, 1  ;;  %s1103_s15 = sphi %s1131_s15, %s14_s15  }
   0x2   : > { %p175_p1 = scmp.lt.s32.totalorder %s1103_s15, 3 }
   0x4   : > { %p176_p2 = pnand %p874_p0, %p175_p1 }
   0x5   : > { %v1065_v0 = vld [vmem:[%s1286_s1 + $0x40] sm:$0xff] (!%p176_p2)   ;;  %v1068_v3 = vld [vmem:[%s1286_s1 + $0x48] sm:$0xff] (!%p176_p2)   ;;  %v1071_v6 = vld [vmem:[%s1286_s1 + $0x50] sm:$0xff] (!%p176_p2)   ;;  %s875_s5 = sshll.u32 (!%p176_p2), %s870_s16, 3  ;;  %v1105_v25 = vmov (!%p176_p2), 0  }
   0x6   : > { %179 = sbr.rel (%p176_p2) target bundleno = 503 (0x1f7), region = 36  ;;  %v1066_v1 = vld [vmem:[%s1286_s1] sm:$0xff] (!%p176_p2)   ;;  %927 = vmatprep.subr.bf16.mxu0 (!%p176_p2), %v1065_v0  ;;  %v1069_v4 = vld [vmem:[%s1286_s1 + $0x8] sm:$0xff] (!%p176_p2)   ;;  %v1072_v7 = vld [vmem:[%s1286_s1 + $0x10] sm:$0xff] (!%p176_p2)   ;;  %p208_p3 = scmp.lt.s32.totalorder (!%p176_p2), %s875_s5, 15 }
   0x7   : > { %v1067_v2 = vld [vmem:[%s1286_s1 + $0x80] sm:$0xff] (!%p176_p2)   ;;  %928 = vmatpush3.bf16.msra.mxu0 (!%p176_p2), %v1066_v1  ;;  %v1070_v5 = vld [vmem:[%s1286_s1 + $0x88] sm:$0xff] (!%p176_p2)   ;;  %v1073_v8 = vld [vmem:[%s1286_s1 + $0x90] sm:$0xff] (!%p176_p2)  }
   0x8   : > { %991 = vmatprep.subr.bf16.mxu1 (!%p176_p2), %v1067_v2  ;;  %929 = vmatprep.subr.bf16.mxu0 (!%p176_p2), %v1068_v3  ;;  %v1074_v9 = vld [vmem:[%s1286_s1 + $0x58] sm:$0xff] (!%p176_p2)   ;;  %v1077_v12 = vld [vmem:[%s1286_s1 + $0x60] sm:$0xff] (!%p176_p2)   ;;  %v1080_v15 = vld [vmem:[%s1286_s1 + $0x68] sm:$0xff] (!%p176_p2)  }
   0x9   : > { %992 = vmatpush3.bf16.msra.mxu1 (!%p176_p2), %v1067_v2  ;;  %v1075_v10 = vld [vmem:[%s1286_s1 + $0x18] sm:$0xff] (!%p176_p2)   ;;  %v1079_v13 = vld [vmem:[%s1286_s1 + $0xa0] sm:$0xff] (!%p176_p2)   ;;  %v1082_v16 = vld [vmem:[%s1286_s1 + $0xa8] sm:$0xff] (!%p176_p2)  }
   0xa   : > { %993 = vmatprep.subr.bf16.mxu1 (!%p176_p2), %v1070_v5  ;;  %v1076_v11 = vld [vmem:[%s1286_s1 + $0x98] sm:$0xff] (!%p176_p2)   ;;  %v1078_v14 = vld [vmem:[%s1286_s1 + $0x20] sm:$0xff] (!%p176_p2)   ;;  %v1081_v17 = vld [vmem:[%s1286_s1 + $0x28] sm:$0xff] (!%p176_p2)  }
   0xb   : > { %930 = vmatpush3.bf16.msra.mxu0 (!%p176_p2), %v1069_v4  ;;  %v1083_v18 = vld [vmem:[%s1286_s1 + $0x70] sm:$0xff] (!%p176_p2)   ;;  %v1086_v21 = vld [vmem:[%s1286_s1 + $0x78] sm:$0xff] (!%p176_p2)   ;;  %v1089_v50 = vld [vmem:[%s1287_s2] sm:$0xff] (!%p176_p2)  }
   0xc   : > { %931 = vmatprep.subr.bf16.mxu0 (!%p176_p2), %v1071_v6  ;;  %v1084_v19 = vld [vmem:[%s1286_s1 + $0x30] sm:$0xff] (!%p176_p2)   ;;  %v1088_v32 = vld [vmem:[%s1286_s1 + $0xb8] sm:$0xff] (!%p176_p2)   ;;  %v1090_v55 = vld [vmem:[%s1287_s2 + $0x8] sm:$0xff] (!%p176_p2)  }
   0xd   : > { %994 = vmatpush3.bf16.msra.mxu1 %v1070_v5  ;;  %s1291_s5 = smov (!%p208_p3, %s875_s5), 15  ;;  %v1085_v20 = vld [vmem:[%s1286_s1 + $0xb0] sm:$0xff]   ;;  %v1087_v36 = vld [vmem:[%s1286_s1 + $0x38] sm:$0xff]  }
   0xe   : > { %995 = vmatprep.subr.bf16.mxu1 %v1073_v8  ;;  %s1055_s25 = smul.u32 12, %s1291_s5  ;;  %v1091_v61 = vld [vmem:[%s1287_s2 + $0x10] sm:$0xff]   ;;  %s878_s12 = sshll.u32 %s1291_s5, 3 }
   0xf   : > { %932 = vmatpush3.bf16.msra.mxu0 %v1072_v7  ;;  %s218_s16 = scalar_lea.vmem %s1288_s3, %s878_s12  ;;  %s224_s19 = scalar_lea.vmem %s1289_s4, %s878_s12 }
  0x10   : > { %933 = vmatprep.subr.bf16.mxu0 %v1074_v9  ;;  %s1205_s11 = scalar_lea.vmem %s1285_s0, %s1055_s25  ;;  %v1093_v9 = vld [vmem:[%s1287_s2 + $0x20] sm:$0xff]  }
  0x11   : > { %996 = vmatpush3.bf16.msra.mxu1 %v1073_v8  ;;  %v227_v22 = vld [vmem:[%s1205_s11] sm:$0xff]  ;;  %v229_v23 = vld [vmem:[%s1205_s11 + $0xc] sm:$0xff]  ;;  %v228_v24 = vld [vmem:[%s1205_s11 + $0x8] sm:$0xf] }
  0x12   : > { %997 = vmatprep.subr.bf16.mxu1 %v1076_v11  ;;  %v243_v26 = vmax.bf16 %v1105_v25, %v227_v22  ;;  %v245_v27 = vmax.bf16 %v1105_v25, %v229_v23  ;;  %v230_v28 = vld [vmem:[%s1205_s11 + $0x14] sm:$0xf]  ;;  %v244_v29 = vmax.bf16 %v1105_v25, %v228_v24  ;;  %v232_v30 = vld [vmem:[%s1205_s11 + $0x20] sm:$0xf]  ;;  %v234_v31 = vld [vmem:[%s1205_s11 + $0x2c] sm:$0xf] }
  0x13   : > { %934 = vmatpush3.bf16.msra.mxu0 %v1075_v10  ;;  %v246_v33 = vmax.bf16 %v1105_v25, %v230_v28  ;;  %v231_v34 = vld [vmem:[%s1205_s11 + $0x18] sm:$0xff]  ;;  %v233_v35 = vld [vmem:[%s1205_s11 + $0x24] sm:$0xff]  ;;  %v248_v43 = vmax.bf16 %v1105_v25, %v232_v30  ;;  %v250_v44 = vmax.bf16 %v1105_v25, %v234_v31  ;;  %v235_v47 = vld [vmem:[%s1205_s11 + $0x30] sm:$0xff] }
  0x14   : > { %935 = vmatprep.subr.bf16.mxu0 %v1077_v12  ;;  %v882_v37 = vcombine.high %v243_v26, %v245_v27  ;;  %v247_v38 = vmax.bf16 %v1105_v25, %v231_v34  ;;  %v249_v39 = vmax.bf16 %v1105_v25, %v233_v35  ;;  %v236_v40 = vld [vmem:[%s1205_s11 + $0x38] sm:$0xf]  ;;  %v238_v41 = vld [vmem:[%s1205_s11 + $0x44] sm:$0xf]  ;;  %v881_v46 = vcombine.low %v243_v26, %v245_v27  ;;  %v237_v48 = vld [vmem:[%s1205_s11 + $0x3c] sm:$0xff] }
  0x15   : > { %998 = vmatpush3.bf16.msra.mxu1 %v1076_v11  ;;  %v883_v42 = vcombine.low %v244_v29, %v246_v33  ;;  %v252_v45 = vmax.bf16 %v1105_v25, %v236_v40  ;;  %v254_v49 = vmax.bf16 %v1105_v25, %v238_v41  ;;  %v240_v52 = vld [vmem:[%s1205_s11 + $0x50] sm:$0xf]  ;;  %v242_v53 = vld [vmem:[%s1205_s11 + $0x5c] sm:$0xf]  ;;  %v886_v54 = vcombine.low %v248_v43, %v250_v44  ;;  %v239_v1 = vld [vmem:[%s1205_s11 + $0x48] sm:$0xff] }
  0x16   : > { %999 = vmatprep.subr.bf16.mxu1 %v1079_v13  ;;  %547 = vmatprep.mubr.bf16.mxu0 %v882_v37  ;;  %v885_v51 = vcombine.high %v247_v38, %v249_v39  ;;  %v251_v57 = vmax.bf16 %v1105_v25, %v235_v47  ;;  %v253_v58 = vmax.bf16 %v1105_v25, %v237_v48  ;;  %v241_v2 = vld [vmem:[%s1205_s11 + $0x54] sm:$0xff]  ;;  %v1094_v10 = vld [vmem:[%s1287_s2 + $0x28] sm:$0xff]  }
  0x17   : > { %936 = vmatpush3.bf16.msra.mxu0 %v1078_v14  ;;  %1007 = vmatprep.mubr.bf16.mxu1 %v883_v42  ;;  %v889_v56 = vcombine.low %v252_v45, %v254_v49  ;;  %v256_v59 = vmax.bf16 %v1105_v25, %v240_v52  ;;  %v258_v60 = vmax.bf16 %v1105_v25, %v242_v53  ;;  %v1092_v8 = vld [vmem:[%s1287_s2 + $0x18] sm:$0xff]   ;;  %v1095_v11 = vld [vmem:[%s1287_s2 + $0x30] sm:$0xff]  }
  0x18   : > { %937 = vmatprep.subr.bf16.mxu0 %v1080_v15  ;;  %v884_v62 = vcombine.low %v247_v38, %v249_v39  ;;  %v888_v63 = vcombine.high %v251_v57, %v253_v58  ;;  %v255_v3 = vmax.bf16 %v1105_v25, %v239_v1  ;;  %v257_v4 = vmax.bf16 %v1105_v25, %v241_v2  ;;  %v1096_v12 = vld [vmem:[%s1287_s2 + $0x38] sm:$0xff]   ;;  %v675_v1 = vld [vmem:[%s218_s16 + $0x10] sm:$0xff]  ;;  %v673_v2 = vld [vmem:[%s218_s16] sm:$0xff] }
  0x19   : > { %1000 = vmatpush3.bf16.msra.mxu1 %v1079_v13  ;;  %v892_v0 = vcombine.low %v256_v59, %v258_v60  ;;  %v887_v5 = vcombine.low %v251_v57, %v253_v58 }
  0x1a   : > { %1001 = vmatprep.subr.bf16.mxu1 %v1082_v16  ;;  %v891_v6 = vcombine.high %v255_v3, %v257_v4  ;;  %v890_v7 = vcombine.low %v255_v3, %v257_v4  ;;  %v676_v4 = vld [vmem:[%s218_s16 + $0x18] sm:$0xff] }
  0x1b   : > { %938 = vmatpush3.bf16.msra.mxu0 %v1081_v17 }
  0x1c   : > { %939 = vmatprep.subr.bf16.mxu0 %v1083_v18 }
  0x1d   : > { %1002 = vmatpush3.bf16.msra.mxu1 %v1082_v16 }
  0x1e   : > { %1003 = vmatprep.subr.bf16.mxu1 %v1085_v20 }
  0x1f   : > { %940 = vmatpush3.bf16.msra.mxu0 %v1084_v19 }
  0x20   : > { %941 = vmatprep.subr.bf16.mxu0 %v1086_v21 }
  0x21   : > { %1004 = vmatpush3.bf16.msra.mxu1 %v1085_v20 }
  0x22   : > { %1005 = vmatprep.subr.bf16.mxu1 %v1088_v32 }
  0x23   : > { %942 = vmatpush3.bf16.msra.mxu0 %v1087_v36 }
  0x24   : > { %1015 = vmatprep.subr.bf16.mxu0 %v1089_v50 }
  0x25   : > { %1006 = vmatpush3.bf16.msra.mxu1 %v1088_v32 }
  0x26   : > { %548 = vmatmul.mubr.bf16.vlgmr.msra.gmra.mrb[0].mxu0 %v881_v46  ;;  %1039 = vmatprep.subr.bf16.mxu1 %v1089_v50 }
  0x27   : > { %555 = vmatprep.mubr.bf16.mxu0 %v885_v51  ;;  %1016 = vmatpush3.bf16.msra.mxu0 %v1089_v50 }
  0x28   : > { %1008 = vmatmul.mubr.bf16.vlgmr.msra.gmra.mrb[0].mxu1 %v886_v54  ;;  %1017 = vmatprep.subr.bf16.mxu0 %v1090_v55 }
  0x29   : > { %1011 = vmatprep.mubr.bf16.mxu1 %v889_v56  ;;  %1047 = vmatpush3.bf16.msra.mxu1 %v1089_v50 }
  0x2a   : > { %1040 = vmatprep.subr.bf16.mxu1 %v1090_v55 }
  0x2b   : > { %1018 = vmatpush3.bf16.msra.mxu0 %v1090_v55 }
  0x2c   : > { %1019 = vmatprep.subr.bf16.mxu0 %v1091_v61 }
  0x2d   : > { %1048 = vmatpush3.bf16.msra.mxu1 %v1090_v55 }
  0x2e   : > { %556 = vmatmul.mubr.bf16.gmra.mrb[4].mxu0 %v884_v62  ;;  %1041 = vmatprep.subr.bf16.mxu1 %v1091_v61 }
  0x2f   : > { %563 = vmatprep.mubr.bf16.mxu0 %v888_v63  ;;  %1020 = vmatpush3.bf16.msra.mxu0 %v1091_v61 }
  0x30   : > { %1012 = vmatmul.mubr.bf16.gmra.mrb[4].mxu1 %v892_v0  ;;  %1021 = vmatprep.subr.bf16.mxu0 %v1092_v8 }
  0x31   : > { %1049 = vmatpush3.bf16.msra.mxu1 %v1091_v61 }
  0x32   : > { %1042 = vmatprep.subr.bf16.mxu1 %v1092_v8 }
  0x33   : > { %1022 = vmatpush3.bf16.msra.mxu0 %v1092_v8 }
  0x34   : > { %1023 = vmatprep.subr.bf16.mxu0 %v1093_v9 }
  0x35   : > { %1050 = vmatpush3.bf16.msra.mxu1 %v1092_v8 }
  0x36   : > { %564 = vmatmul.mubr.bf16.gmra.mrb[8].mxu0 %v887_v5  ;;  %1043 = vmatprep.subr.bf16.mxu1 %v1093_v9 }
  0x37   : > { %571 = vmatprep.mubr.bf16.mxu0 %v891_v6  ;;  %1024 = vmatpush3.bf16.msra.mxu0 %v1093_v9 }
  0x38   : > { %1025 = vmatprep.subr.bf16.mxu0 %v1094_v10 }
  0x39   : > { %1051 = vmatpush3.bf16.msra.mxu1 %v1093_v9 }
  0x3a   : > { %1044 = vmatprep.subr.bf16.mxu1 %v1094_v10 }
  0x3b   : > { %1026 = vmatpush3.bf16.msra.mxu0 %v1094_v10 }
  0x3c   : > { %1027 = vmatprep.subr.bf16.mxu0 %v1095_v11 }
  0x3d   : > { %1052 = vmatpush3.bf16.msra.mxu1 %v1094_v10 }
  0x3e   : > { %572 = vmatmul.mubr.bf16.gmra.mrb[12].mxu0 %v890_v7  ;;  %1045 = vmatprep.subr.bf16.mxu1 %v1095_v11  ;;  %v674_v7 = vld [vmem:[%s218_s16 + $0x8] sm:$0xff] }
  0x3f   : > { %1028 = vmatpush3.bf16.msra.mxu0 %v1095_v11 }
  0x40   : > { %1029 = vmatprep.subr.bf16.mxu0 %v1096_v12 }
  0x41   : > { %1053 = vmatpush3.bf16.msra.mxu1 %v1095_v11 }
  0x42   : > { %1046 = vmatprep.subr.bf16.mxu1 %v1096_v12 }
  0x43   : > { %1030 = vmatpush3.bf16.msra.mxu0 %v1096_v12 }
  0x45   : > { %1054 = vmatpush3.bf16.msra.mxu1 %v1096_v12 }
  0xf9   : > { %v943_v13 = vpop.f32.mrb[0].mxu0 }
  0xfa   : > { %v944_v14 = vpop.f32.mrb[1].mxu0 }
  0xfb   : > { %v945_v15 = vadd.f32 %v944_v14, %v943_v13  ;;  %v946_v16 = vpop.f32.mrb[2].mxu0  ;;  %v1009_v17 = vpop.f32.mrb[0].mxu1  ;;  %v679_v13 = vld [vmem:[%s218_s16 + $0x30] sm:$0xff]  ;;  %v677_v14 = vld [vmem:[%s218_s16 + $0x20] sm:$0xff] }
  0xfc   : > { %v947_v18 = vpop.f32.mrb[3].mxu0  ;;  %v614_v19 = vpop.f32.mrb[1].mxu1 }
  0xfd   : > { %v948_v20 = vadd.f32 %v947_v18, %v946_v16  ;;  %v615_v21 = vadd.f32 %v945_v15, %v614_v19  ;;  %v1010_v22 = vpop.f32.mrb[2].mxu1  ;;  %v680_v16 = vld [vmem:[%s218_s16 + $0x38] sm:$0xff]  ;;  %v678_v19 = vld [vmem:[%s218_s16 + $0x28] sm:$0xff] }
  0xfe   : > { %v617_v23 = vpop.f32.mrb[3].mxu1 }
  0xff   : > { %v618_v24 = vadd.f32 %v948_v20, %v617_v23  ;;  %v645_v25 = vmax.f32 %v615_v21, 0.0 }
 0x101   : > { %v646_v26 = vmax.f32 %v618_v24, 0.0  ;;  %v949_v27 = vpop.f32.mrb[4].mxu0 }
 0x102   : > { %v950_v28 = vpop.f32.mrb[5].mxu0 }
 0x103   : > { %v653_v29 = vpack.c.bf16 %v646_v26, %v645_v25  ;;  %v951_v30 = vadd.f32 %v950_v28, %v949_v27  ;;  %v952_v31 = vpop.f32.mrb[6].mxu0  ;;  %v1013_v32 = vpop.f32.mrb[4].mxu1 }
 0x104   : > { %v953_v33 = vpop.f32.mrb[7].mxu0  ;;  %v630_v34 = vpop.f32.mrb[5].mxu1 }
 0x105   : > { %v623_v35 = vadd.f32 %v1009_v17, %v951_v30  ;;  %v954_v36 = vadd.f32 %v953_v33, %v952_v31  ;;  %1031 = vmatprep.mubr.bf16.mxu0 %v653_v29  ;;  %v1014_v37 = vpop.f32.mrb[6].mxu1 }
 0x106   : > { %v633_v38 = vpop.f32.mrb[7].mxu1 }
 0x107   : > { %v626_v39 = vadd.f32 %v1010_v22, %v954_v36  ;;  %v647_v40 = vmax.f32 %v623_v35, 0.0 }
 0x109   : > { %v648_v41 = vmax.f32 %v626_v39, 0.0  ;;  %v955_v42 = vpop.f32.mrb[8].mxu0 }
 0x10a   : > { %v956_v43 = vpop.f32.mrb[9].mxu0 }
 0x10b   : > { %v654_v44 = vpack.c.bf16 %v648_v41, %v647_v40  ;;  %v957_v45 = vadd.f32 %v956_v43, %v955_v42  ;;  %v958_v46 = vpop.f32.mrb[10].mxu0 }
 0x10c   : > { %v959_v47 = vpop.f32.mrb[11].mxu0 }
 0x10d   : > { %v960_v48 = vadd.f32 %v959_v47, %v958_v46  ;;  %v631_v49 = vadd.f32 %v957_v45, %v630_v34  ;;  %1032 = vmatmul.mubr.bf16.vlgmr.msra.gmra.mrb[16].mxu0 %v654_v44 }
 0x10f   : > { %v634_v50 = vadd.f32 %v960_v48, %v633_v38  ;;  %v649_v51 = vmax.f32 %v631_v49, 0.0 }
 0x111   : > { %v650_v52 = vmax.f32 %v634_v50, 0.0  ;;  %v961_v53 = vpop.f32.mrb[12].mxu0 }
 0x112   : > { %v962_v54 = vpop.f32.mrb[13].mxu0 }
 0x113   : > { %v655_v55 = vpack.c.bf16 %v650_v52, %v649_v51  ;;  %v963_v56 = vadd.f32 %v962_v54, %v961_v53  ;;  %v964_v57 = vpop.f32.mrb[14].mxu0 }
 0x114   : > { %v965_v58 = vpop.f32.mrb[15].mxu0 }
 0x115   : > { %v639_v59 = vadd.f32 %v1013_v32, %v963_v56  ;;  %v966_v60 = vadd.f32 %v965_v58, %v964_v57  ;;  %1035 = vmatprep.mubr.bf16.mxu1 %v655_v55 }
 0x117   : > { %v642_v61 = vadd.f32 %v1014_v37, %v966_v60  ;;  %v651_v62 = vmax.f32 %v639_v59, 0.0 }
 0x119   : > { %v652_v63 = vmax.f32 %v642_v61, 0.0 }
 0x11b   : > { %v656_v0 = vpack.c.bf16 %v652_v63, %v651_v62 }
 0x11d   : > { %1036 = vmatmul.mubr.bf16.vlgmr.msra.gmra.mrb[8].mxu1 %v656_v0 }
 0x1e0   : > { %v1033_v3 = vpop.f32.mrb[16].mxu0 }
 0x1e1   : > { %v772_v5 = vadd.f32 %v1033_v3, %v675_v1  ;;  %v763_v6 = vpop.f32.mrb[17].mxu0 }
 0x1e2   : > { %v764_v8 = vadd.f32 %v763_v6, %v673_v2  ;;  %v1034_v9 = vpop.f32.mrb[18].mxu0 }
 0x1e3   : > { %796 = vst [vmem:[%s224_s19 + $0x10] sm:$0xff] %v772_v5  ;;  %v775_v10 = vadd.f32 %v1034_v9, %v676_v4  ;;  %v766_v11 = vpop.f32.mrb[19].mxu0 }
 0x1e4   : > { %794 = vst [vmem:[%s224_s19] sm:$0xff] %v764_v8  ;;  %v767_v12 = vadd.f32 %v766_v11, %v674_v7 }
 0x1e5   : > { %797 = vst [vmem:[%s224_s19 + $0x18] sm:$0xff] %v775_v10 }
 0x1e6   : > { %795 = vst [vmem:[%s224_s19 + $0x8] sm:$0xff] %v767_v12 }
 0x1f0   : > { %v1037_v15 = vpop.f32.mrb[8].mxu1 }
 0x1f1   : > { %v788_v17 = vadd.f32 %v1037_v15, %v679_v13  ;;  %v779_v18 = vpop.f32.mrb[9].mxu1 }
 0x1f2   : > { %v780_v20 = vadd.f32 %v779_v18, %v677_v14  ;;  %v1038_v21 = vpop.f32.mrb[10].mxu1 }
 0x1f3   : > { %800 = vst [vmem:[%s224_s19 + $0x30] sm:$0xff] %v788_v17  ;;  %v791_v22 = vadd.f32 %v1038_v21, %v680_v16  ;;  %v782_v23 = vpop.f32.mrb[11].mxu1 }
 0x1f4   : > { %798 = vst [vmem:[%s224_s19 + $0x20] sm:$0xff] %v780_v20  ;;  %v783_v24 = vadd.f32 %v782_v23, %v678_v19 }
 0x1f5   : > { %801 = vst [vmem:[%s224_s19 + $0x38] sm:$0xff] %v791_v22 }
 0x1f6   : > { %799 = vst [vmem:[%s224_s19 + $0x28] sm:$0xff] %v783_v24 }
 0x1f7 PF: > { %s14_s15 = sadd.s32 1, %s1103_s15  }
 0x1f8   : > { %p11_p4 = scmp.ge.s32.totalorder %s14_s15, 4  }
 0x1fa   :  { %13 = sbr.rel (!%p11_p4) target bundleno = 1 (0x1), region = 69 }

// kernel: decoder_forward.8
= control target key start
LH: loop header
LB: loop body
LE: loop exit
PB: predicated region body
PF: predicated region fallthrough
CT: control target
= control target key end

     0   :  { %v982_v24 = vmov 0   ;;  %s985_s30 = smov 64   ;;  %s1386_s1 = inlined_call_operand.vmem [shape: bf16[384,128], index: 1, kind: input, shape index: {}]   ;;  %s1387_s0 = inlined_call_operand.vmem [shape: bf16[128,384], index: 0, kind: input, shape index: {}]   ;;  %s1388_s2 = inlined_call_operand.vmem [shape: f32[1,128], index: 2, kind: input, shape index: {}]   ;;  %s1389_s3 = inlined_call_operand.vmem [shape: f32[1,128], index: 3, kind: input, shape index: {}]   ;;  %s1390_s4 = inlined_call_operand.vmem [shape: f32[1,128], index: 4, kind: input, shape index: {}]   ;;  %s1391_s5 = inlined_call_operand.vmem [shape: f32[128,128], index: 5, kind: output, shape index: {}]  }
   0x1   :  { %v956_v0 = vld [vmem:[%s1386_s1 + $0x40] sm:$0xff]   ;;  %v958_v2 = vld [vmem:[%s1386_s1 + $0x48] sm:$0xff]   ;;  %v961_v5 = vld [vmem:[%s1386_s1 + $0x50] sm:$0xff]  }
   0x2   :  { %v957_v1 = vld [vmem:[%s1386_s1] sm:$0xff]   ;;  %840 = vmatprep.subr.bf16.mxu0 %v956_v0  ;;  %v960_v4 = vld [vmem:[%s1386_s1 + $0x8] sm:$0xff]   ;;  %v963_v7 = vld [vmem:[%s1386_s1 + $0x10] sm:$0xff]  }
   0x3   :  { %841 = vmatpush3.bf16.msra.mxu0 %v957_v1  ;;  %v959_v3 = vld [vmem:[%s1386_s1 + $0x80] sm:$0xff]   ;;  %v962_v6 = vld [vmem:[%s1386_s1 + $0x88] sm:$0xff]   ;;  %v964_v8 = vld [vmem:[%s1386_s1 + $0x58] sm:$0xff]  }
   0x4   :  { %842 = vmatprep.subr.bf16.mxu0 %v958_v2  ;;  %920 = vmatprep.subr.bf16.mxu1 %v959_v3  ;;  %v965_v9 = vld [vmem:[%s1386_s1 + $0x90] sm:$0xff]   ;;  %v966_v10 = vld [vmem:[%s1386_s1 + $0x18] sm:$0xff]   ;;  %v967_v11 = vld [vmem:[%s1386_s1 + $0x60] sm:$0xff]  }
   0x5   :  { %921 = vmatpush3.bf16.msra.mxu1 %v959_v3  ;;  %v968_v12 = vld [vmem:[%s1386_s1 + $0x98] sm:$0xff]   ;;  %v969_v13 = vld [vmem:[%s1386_s1 + $0x20] sm:$0xff]   ;;  %v970_v15 = vld [vmem:[%s1386_s1 + $0x68] sm:$0xff]  }
   0x6   :  { %922 = vmatprep.subr.bf16.mxu1 %v962_v6  ;;  %v971_v14 = vld [vmem:[%s1386_s1 + $0xa0] sm:$0xff]   ;;  %v972_v16 = vld [vmem:[%s1386_s1 + $0x28] sm:$0xff]   ;;  %v973_v18 = vld [vmem:[%s1386_s1 + $0x70] sm:$0xff]  }
   0x7   :  { %843 = vmatpush3.bf16.msra.mxu0 %v960_v4  ;;  %v974_v17 = vld [vmem:[%s1386_s1 + $0xa8] sm:$0xff]   ;;  %v975_v19 = vld [vmem:[%s1386_s1 + $0x30] sm:$0xff]   ;;  %v21_v21 = vld [vmem:[%s1387_s0] sm:$0xff] }
   0x8   :  { %844 = vmatprep.subr.bf16.mxu0 %v961_v5  ;;  %v977_v20 = vld [vmem:[%s1386_s1 + $0xb0] sm:$0xff]   ;;  %v976_v23 = vld [vmem:[%s1386_s1 + $0x78] sm:$0xff]   ;;  %v53_v25 = vmax.bf16 %v982_v24, %v21_v21  ;;  %v22_v27 = vld [vmem:[%s1387_s0 + $0x8] sm:$0xf] }
   0x9   :  { %923 = vmatpush3.bf16.msra.mxu1 %v962_v6  ;;  %v23_v22 = vld [vmem:[%s1387_s0 + $0xc] sm:$0xff]  ;;  %v978_v28 = vld [vmem:[%s1386_s1 + $0x38] sm:$0xff]   ;;  %v24_v29 = vld [vmem:[%s1387_s0 + $0x14] sm:$0xf]  ;;  %v54_v30 = vmax.bf16 %v982_v24, %v22_v27 }
   0xa   :  { %924 = vmatprep.subr.bf16.mxu1 %v965_v9  ;;  %v55_v26 = vmax.bf16 %v982_v24, %v23_v22  ;;  %v26_v31 = vld [vmem:[%s1387_s0 + $0x20] sm:$0xf]  ;;  %v56_v33 = vmax.bf16 %v982_v24, %v24_v29  ;;  %v28_v34 = vld [vmem:[%s1387_s0 + $0x2c] sm:$0xf]  ;;  %v25_v35 = vld [vmem:[%s1387_s0 + $0x18] sm:$0xff] }
   0xb   :  { %845 = vmatpush3.bf16.msra.mxu0 %v963_v7  ;;  %v27_v36 = vld [vmem:[%s1387_s0 + $0x24] sm:$0xff]  ;;  %v979_v37 = vld [vmem:[%s1386_s1 + $0xb8] sm:$0xff]   ;;  %v57_v38 = vmax.bf16 %v982_v24, %v25_v35  ;;  %v58_v43 = vmax.bf16 %v982_v24, %v26_v31  ;;  %v60_v44 = vmax.bf16 %v982_v24, %v28_v34  ;;  %v29_v49 = vld [vmem:[%s1387_s0 + $0x30] sm:$0xff] }
   0xc   :  { %846 = vmatprep.subr.bf16.mxu0 %v964_v8  ;;  %v793_v32 = vcombine.high %v53_v25, %v55_v26  ;;  %v59_v39 = vmax.bf16 %v982_v24, %v27_v36  ;;  %v30_v40 = vld [vmem:[%s1387_s0 + $0x38] sm:$0xf]  ;;  %v32_v41 = vld [vmem:[%s1387_s0 + $0x44] sm:$0xf]  ;;  %v794_v42 = vcombine.low %v54_v30, %v56_v33  ;;  %v792_v45 = vcombine.low %v53_v25, %v55_v26  ;;  %v31_v50 = vld [vmem:[%s1387_s0 + $0x3c] sm:$0xff] }
   0xd   :  { %925 = vmatpush3.bf16.msra.mxu1 %v965_v9  ;;  %v62_v46 = vmax.bf16 %v982_v24, %v30_v40  ;;  %v64_v47 = vmax.bf16 %v982_v24, %v32_v41  ;;  %v797_v51 = vcombine.low %v58_v43, %v60_v44  ;;  %v34_v53 = vld [vmem:[%s1387_s0 + $0x50] sm:$0xf]  ;;  %v36_v54 = vld [vmem:[%s1387_s0 + $0x5c] sm:$0xf]  ;;  %v61_v55 = vmax.bf16 %v982_v24, %v29_v49  ;;  %v38_v57 = vld [vmem:[%s1387_s0 + $0x68] sm:$0xf] }
   0xe   :  { %926 = vmatprep.subr.bf16.mxu1 %v968_v12  ;;  %444 = vmatprep.mubr.bf16.mxu0 %v793_v32  ;;  %v796_v48 = vcombine.high %v57_v38, %v59_v39  ;;  %v63_v56 = vmax.bf16 %v982_v24, %v31_v50  ;;  %v40_v58 = vld [vmem:[%s1387_s0 + $0x74] sm:$0xf]  ;;  %v66_v59 = vmax.bf16 %v982_v24, %v34_v53  ;;  %v33_v1 = vld [vmem:[%s1387_s0 + $0x48] sm:$0xff]  ;;  %v42_v5 = vld [vmem:[%s1387_s0 + $0x80] sm:$0xf] }
   0xf   :  { %847 = vmatpush3.bf16.msra.mxu0 %v966_v10  ;;  %936 = vmatprep.mubr.bf16.mxu1 %v794_v42  ;;  %v800_v52 = vcombine.low %v62_v46, %v64_v47  ;;  %v68_v60 = vmax.bf16 %v982_v24, %v36_v54  ;;  %v795_v61 = vcombine.low %v57_v38, %v59_v39  ;;  %v35_v2 = vld [vmem:[%s1387_s0 + $0x54] sm:$0xff]  ;;  %v44_v6 = vld [vmem:[%s1387_s0 + $0x8c] sm:$0xf]  ;;  %v48_v10 = vld [vmem:[%s1387_s0 + $0xa4] sm:$0xf] }
  0x10   :  { %848 = vmatprep.subr.bf16.mxu0 %v967_v11  ;;  %v70_v62 = vmax.bf16 %v982_v24, %v38_v57  ;;  %v72_v63 = vmax.bf16 %v982_v24, %v40_v58  ;;  %v799_v0 = vcombine.high %v61_v55, %v63_v56  ;;  %v65_v7 = vmax.bf16 %v982_v24, %v33_v1  ;;  %v46_v9 = vld [vmem:[%s1387_s0 + $0x98] sm:$0xf]  ;;  %v50_v21 = vld [vmem:[%s1387_s0 + $0xb0] sm:$0xf]  ;;  %v52_v22 = vld [vmem:[%s1387_s0 + $0xbc] sm:$0xf] }
  0x11   :  { %927 = vmatpush3.bf16.msra.mxu1 %v968_v12  ;;  %v803_v3 = vcombine.low %v66_v59, %v68_v60  ;;  %v67_v8 = vmax.bf16 %v982_v24, %v35_v2  ;;  %v74_v11 = vmax.bf16 %v982_v24, %v42_v5  ;;  %v76_v12 = vmax.bf16 %v982_v24, %v44_v6  ;;  %v41_v30 = vld [vmem:[%s1387_s0 + $0x78] sm:$0xff]  ;;  %v43_v31 = vld [vmem:[%s1387_s0 + $0x84] sm:$0xff] }
  0x12   :  { %928 = vmatprep.subr.bf16.mxu1 %v971_v14  ;;  %v806_v4 = vcombine.low %v70_v62, %v72_v63  ;;  %v82_v26 = vmax.bf16 %v982_v24, %v50_v21  ;;  %v84_v27 = vmax.bf16 %v982_v24, %v52_v22  ;;  %v73_v33 = vmax.bf16 %v982_v24, %v41_v30  ;;  %v47_v38 = vld [vmem:[%s1387_s0 + $0x9c] sm:$0xff]  ;;  %v49_v43 = vld [vmem:[%s1387_s0 + $0xa8] sm:$0xff]  ;;  %v51_v44 = vld [vmem:[%s1387_s0 + $0xb4] sm:$0xff] }
  0x13   :  { %849 = vmatpush3.bf16.msra.mxu0 %v969_v13  ;;  %v798_v13 = vcombine.low %v61_v55, %v63_v56  ;;  %v75_v34 = vmax.bf16 %v982_v24, %v43_v31  ;;  %v79_v40 = vmax.bf16 %v982_v24, %v47_v38  ;;  %v83_v46 = vmax.bf16 %v982_v24, %v51_v44 }
  0x14   :  { %850 = vmatprep.subr.bf16.mxu0 %v970_v15  ;;  %v80_v15 = vmax.bf16 %v982_v24, %v48_v10  ;;  %v815_v32 = vcombine.low %v82_v26, %v84_v27 }
  0x15   :  { %929 = vmatpush3.bf16.msra.mxu1 %v971_v14  ;;  %v78_v14 = vmax.bf16 %v982_v24, %v46_v9  ;;  %v808_v36 = vcombine.high %v73_v33, %v75_v34  ;;  %v807_v41 = vcombine.low %v73_v33, %v75_v34 }
  0x16   :  { %930 = vmatprep.subr.bf16.mxu1 %v974_v17 }
  0x17   :  { %851 = vmatpush3.bf16.msra.mxu0 %v972_v16  ;;  %v802_v16 = vcombine.high %v65_v7, %v67_v8 }
  0x18   :  { %852 = vmatprep.subr.bf16.mxu0 %v973_v18  ;;  %v39_v18 = vld [vmem:[%s1387_s0 + $0x6c] sm:$0xff] }
  0x19   :  { %931 = vmatpush3.bf16.msra.mxu1 %v974_v17  ;;  %v37_v17 = vld [vmem:[%s1387_s0 + $0x60] sm:$0xff]  ;;  %v71_v25 = vmax.bf16 %v982_v24, %v39_v18 }
  0x1a   :  { %932 = vmatprep.subr.bf16.mxu1 %v977_v20 }
  0x1b   :  { %853 = vmatpush3.bf16.msra.mxu0 %v975_v19  ;;  %v809_v19 = vcombine.low %v74_v11, %v76_v12 }
  0x1c   :  { %854 = vmatprep.subr.bf16.mxu0 %v976_v23  ;;  %v69_v23 = vmax.bf16 %v982_v24, %v37_v17 }
  0x1d   :  { %933 = vmatpush3.bf16.msra.mxu1 %v977_v20  ;;  %v812_v20 = vcombine.low %v78_v14, %v80_v15 }
  0x1e   :  { %934 = vmatprep.subr.bf16.mxu1 %v979_v37  ;;  %v805_v29 = vcombine.high %v69_v23, %v71_v25  ;;  %v804_v35 = vcombine.low %v69_v23, %v71_v25 }
  0x1f   :  { %855 = vmatpush3.bf16.msra.mxu0 %v978_v28  ;;  %v801_v28 = vcombine.low %v65_v7, %v67_v8 }
  0x21   :  { %935 = vmatpush3.bf16.msra.mxu1 %v979_v37  ;;  %v45_v37 = vld [vmem:[%s1387_s0 + $0x90] sm:$0xff]  ;;  %s983_s0 = smov 96  }
  0x22   :  { %445 = vmatmul.mubr.bf16.vlgmr.msra.gmra.mrb[0].mxu0 %v792_v45  ;;  %v77_v39 = vmax.bf16 %v982_v24, %v45_v37  ;;  %v81_v45 = vmax.bf16 %v982_v24, %v49_v43 }
  0x23   :  { %452 = vmatprep.mubr.bf16.mxu0 %v796_v48 }
  0x24   :  { %937 = vmatmul.mubr.bf16.vlgmr.msra.gmra.mrb[0].mxu1 %v797_v51  ;;  %v811_v42 = vcombine.high %v77_v39, %v79_v40  ;;  %v810_v47 = vcombine.low %v77_v39, %v79_v40  ;;  %v814_v48 = vcombine.high %v81_v45, %v83_v46  ;;  %v813_v49 = vcombine.low %v81_v45, %v83_v46 }
  0x25   :  { %940 = vmatprep.mubr.bf16.mxu1 %v800_v52  ;;  %v1219_v52 = vld [vmem:[%s1388_s2] ss:$0 sm:$0xff]  ;;  %s984_s2 = smov 32  }
  0x2a   :  { %453 = vmatmul.mubr.bf16.gmra.mrb[4].mxu0 %v795_v61 }
  0x2b   :  { %460 = vmatprep.mubr.bf16.mxu0 %v799_v0 }
  0x2c   :  { %941 = vmatmul.mubr.bf16.gmra.mrb[4].mxu1 %v803_v3 }
  0x2d   :  { %944 = vmatprep.mubr.bf16.mxu1 %v806_v4 }
  0x32   :  { %461 = vmatmul.mubr.bf16.gmra.mrb[8].mxu0 %v798_v13 }
  0x33   :  { %468 = vmatprep.mubr.bf16.mxu0 %v802_v16 }
  0x34   :  { %945 = vmatmul.mubr.bf16.gmra.mrb[8].mxu1 %v809_v19 }
  0x35   :  { %948 = vmatprep.mubr.bf16.mxu1 %v812_v20 }
  0x3a   :  { %469 = vmatmul.mubr.bf16.gmra.mrb[12].mxu0 %v801_v28 }
  0x3b   :  { %476 = vmatprep.mubr.bf16.mxu0 %v805_v29 }
  0x3c   :  { %949 = vmatmul.mubr.bf16.gmra.mrb[12].mxu1 %v815_v32 }
  0x42   :  { %477 = vmatmul.mubr.bf16.gmra.mrb[16].mxu0 %v804_v35 }
  0x43   :  { %484 = vmatprep.mubr.bf16.mxu0 %v808_v36 }
  0x4a   :  { %485 = vmatmul.mubr.bf16.gmra.mrb[20].mxu0 %v807_v41 }
  0x4b   :  { %492 = vmatprep.mubr.bf16.mxu0 %v811_v42 }
  0x52   :  { %493 = vmatmul.mubr.bf16.gmra.mrb[24].mxu0 %v810_v47 }
  0x53   :  { %500 = vmatprep.mubr.bf16.mxu0 %v814_v48 }
  0x5a   :  { %501 = vmatmul.mubr.bf16.gmra.mrb[28].mxu0 %v813_v49 }
  0xf5   :  { %v856_v50 = vpop.f32.mrb[0].mxu0 }
  0xf6   :  { %v857_v51 = vpop.f32.mrb[1].mxu0 }
  0xf7   :  { %v858_v53 = vadd.f32 %v857_v51, %v856_v50  ;;  %v859_v54 = vpop.f32.mrb[2].mxu0  ;;  %v938_v56 = vpop.f32.mrb[0].mxu1 }
  0xf8   :  { %v860_v55 = vpop.f32.mrb[3].mxu0  ;;  %v543_v58 = vpop.f32.mrb[1].mxu1 }
  0xf9   :  { %v861_v57 = vadd.f32 %v860_v55, %v859_v54  ;;  %v447_v24 = vadd.f32 %v858_v53, %v1219_v52  ;;  %v939_v59 = vpop.f32.mrb[2].mxu1 }
  0xfa   :  { %v546_v62 = vpop.f32.mrb[3].mxu1 }
  0xfb   :  { %v1222_v60 = vadd.f32 %v543_v58, %v447_v24  ;;  %v450_v61 = vadd.f32 %v861_v57, %v1219_v52 }
  0xfd   :  { %v1225_v63 = vadd.f32 %v546_v62, %v450_v61  ;;  %v862_v0 = vpop.f32.mrb[4].mxu0 }
  0xfe   :  { %v863_v1 = vpop.f32.mrb[5].mxu0 }
  0xff   :  { %v864_v2 = vadd.f32 %v863_v1, %v862_v0  ;;  %v865_v3 = vpop.f32.mrb[6].mxu0  ;;  %v942_v5 = vpop.f32.mrb[4].mxu1  ;;  %v606_v31 = vadd.f32 %v1225_v63, %v1222_v60 }
 0x100   :  { %v866_v4 = vpop.f32.mrb[7].mxu0  ;;  %v559_v8 = vpop.f32.mrb[5].mxu1 }
 0x101   :  { %v455_v6 = vadd.f32 %v864_v2, %v1219_v52  ;;  %v867_v7 = vadd.f32 %v866_v4, %v865_v3  ;;  %v943_v9 = vpop.f32.mrb[6].mxu1 }
 0x102   :  { %v562_v12 = vpop.f32.mrb[7].mxu1 }
 0x103   :  { %v1228_v10 = vadd.f32 %v938_v56, %v455_v6  ;;  %v458_v11 = vadd.f32 %v867_v7, %v1219_v52 }
 0x105   :  { %v1231_v13 = vadd.f32 %v939_v59, %v458_v11  ;;  %v868_v14 = vpop.f32.mrb[8].mxu0  ;;  %v607_v36 = vadd.f32 %v606_v31, %v1228_v10 }
 0x106   :  { %v869_v15 = vpop.f32.mrb[9].mxu0 }
 0x107   :  { %v870_v16 = vadd.f32 %v869_v15, %v868_v14  ;;  %v871_v17 = vpop.f32.mrb[10].mxu0  ;;  %v946_v19 = vpop.f32.mrb[8].mxu1  ;;  %v608_v44 = vadd.f32 %v607_v36, %v1231_v13 }
 0x108   :  { %v872_v18 = vpop.f32.mrb[11].mxu0  ;;  %v575_v22 = vpop.f32.mrb[9].mxu1 }
 0x109   :  { %v873_v20 = vadd.f32 %v872_v18, %v871_v17  ;;  %v463_v21 = vadd.f32 %v870_v16, %v1219_v52  ;;  %v947_v23 = vpop.f32.mrb[10].mxu1 }
 0x10a   :  { %v578_v27 = vpop.f32.mrb[11].mxu1 }
 0x10b   :  { %v1234_v25 = vadd.f32 %v559_v8, %v463_v21  ;;  %v466_v26 = vadd.f32 %v873_v20, %v1219_v52 }
 0x10d   :  { %v1237_v28 = vadd.f32 %v562_v12, %v466_v26  ;;  %v874_v29 = vpop.f32.mrb[12].mxu0  ;;  %v609_v48 = vadd.f32 %v608_v44, %v1234_v25 }
 0x10e   :  { %v875_v30 = vpop.f32.mrb[13].mxu0 }
 0x10f   :  { %v876_v32 = vadd.f32 %v875_v30, %v874_v29  ;;  %v877_v33 = vpop.f32.mrb[14].mxu0  ;;  %v950_v35 = vpop.f32.mrb[12].mxu1  ;;  %v610_v55 = vadd.f32 %v609_v48, %v1237_v28 }
 0x110   :  { %v878_v34 = vpop.f32.mrb[15].mxu0  ;;  %v591_v39 = vpop.f32.mrb[13].mxu1 }
 0x111   :  { %v471_v37 = vadd.f32 %v876_v32, %v1219_v52  ;;  %v879_v38 = vadd.f32 %v878_v34, %v877_v33  ;;  %v951_v40 = vpop.f32.mrb[14].mxu1 }
 0x112   :  { %v594_v43 = vpop.f32.mrb[15].mxu1 }
 0x113   :  { %v1243_v41 = vadd.f32 %v942_v5, %v471_v37  ;;  %v474_v42 = vadd.f32 %v879_v38, %v1219_v52 }
 0x115   :  { %v1247_v45 = vadd.f32 %v943_v9, %v474_v42  ;;  %v880_v46 = vpop.f32.mrb[16].mxu0  ;;  %v611_v24 = vadd.f32 %v610_v55, %v1243_v41 }
 0x116   :  { %v881_v47 = vpop.f32.mrb[17].mxu0 }
 0x117   :  { %v882_v49 = vadd.f32 %v881_v47, %v880_v46  ;;  %v883_v50 = vpop.f32.mrb[18].mxu0  ;;  %v612_v2 = vadd.f32 %v611_v24, %v1247_v45 }
 0x118   :  { %v884_v51 = vpop.f32.mrb[19].mxu0 }
 0x119   :  { %v885_v53 = vadd.f32 %v884_v51, %v883_v50  ;;  %v479_v54 = vadd.f32 %v882_v49, %v1219_v52 }
 0x11b   :  { %v1252_v56 = vadd.f32 %v575_v22, %v479_v54  ;;  %v482_v57 = vadd.f32 %v885_v53, %v1219_v52 }
 0x11d   :  { %v1256_v58 = vadd.f32 %v578_v27, %v482_v57  ;;  %v886_v59 = vpop.f32.mrb[20].mxu0  ;;  %v613_v5 = vadd.f32 %v612_v2, %v1252_v56 }
 0x11e   :  { %v887_v61 = vpop.f32.mrb[21].mxu0 }
 0x11f   :  { %v888_v62 = vadd.f32 %v887_v61, %v886_v59  ;;  %v889_v0 = vpop.f32.mrb[22].mxu0  ;;  %v614_v12 = vadd.f32 %v613_v5, %v1256_v58 }
 0x120   :  { %v890_v1 = vpop.f32.mrb[23].mxu0 }
 0x121   :  { %v487_v3 = vadd.f32 %v888_v62, %v1219_v52  ;;  %v891_v4 = vadd.f32 %v890_v1, %v889_v0 }
 0x123   :  { %v1261_v6 = vadd.f32 %v946_v19, %v487_v3  ;;  %v490_v7 = vadd.f32 %v891_v4, %v1219_v52 }
 0x125   :  { %v1264_v8 = vadd.f32 %v947_v23, %v490_v7  ;;  %v892_v9 = vpop.f32.mrb[24].mxu0  ;;  %v615_v20 = vadd.f32 %v614_v12, %v1261_v6 }
 0x126   :  { %v893_v11 = vpop.f32.mrb[25].mxu0 }
 0x127   :  { %v894_v14 = vadd.f32 %v893_v11, %v892_v9  ;;  %v895_v15 = vpop.f32.mrb[26].mxu0  ;;  %v616_v22 = vadd.f32 %v615_v20, %v1264_v8 }
 0x128   :  { %v896_v16 = vpop.f32.mrb[27].mxu0 }
 0x129   :  { %v897_v17 = vadd.f32 %v896_v16, %v895_v15  ;;  %v495_v18 = vadd.f32 %v894_v14, %v1219_v52 }
 0x12b   :  { %v1269_v21 = vadd.f32 %v591_v39, %v495_v18  ;;  %v498_v19 = vadd.f32 %v897_v17, %v1219_v52 }
 0x12d   :  { %v1273_v23 = vadd.f32 %v594_v43, %v498_v19  ;;  %v898_v26 = vpop.f32.mrb[28].mxu0  ;;  %v617_v29 = vadd.f32 %v616_v22, %v1269_v21 }
 0x12e   :  { %v899_v27 = vpop.f32.mrb[29].mxu0 }
 0x12f   :  { %v900_v30 = vadd.f32 %v899_v27, %v898_v26  ;;  %v901_v31 = vpop.f32.mrb[30].mxu0  ;;  %v618_v36 = vadd.f32 %v617_v29, %v1273_v23 }
 0x130   :  { %v902_v32 = vpop.f32.mrb[31].mxu0 }
 0x131   :  { %v503_v33 = vadd.f32 %v900_v30, %v1219_v52  ;;  %v903_v34 = vadd.f32 %v902_v32, %v901_v31 }
 0x133   :  { %v1278_v37 = vadd.f32 %v950_v35, %v503_v33  ;;  %v506_v38 = vadd.f32 %v903_v34, %v1219_v52  ;;  %v637_v52 = vlaneseq }
 0x135   :  { %v619_v39 = vadd.f32 %v618_v36, %v1278_v37  ;;  %v1282_v42 = vadd.f32 %v951_v40, %v506_v38  ;;  %v638_v51 = vshrl.u32 %v637_v52, 7 }
 0x137   :  { %v620_v43 = vadd.f32 %v619_v39, %v1282_v42  ;;  %v1288_v57 = vsub.s32 0, %v638_v51 }
 0x139   :  { %v621_v44 = vrot.slane %v620_v43, 4 }
 0x13b   :  { %v622_v46 = vadd.f32 %v621_v44, %v620_v43 }
 0x13d   :  { %v623_v47 = vrot.slane %v622_v46, 2 }
 0x13f   :  { %v624_v48 = vadd.f32 %v623_v47, %v622_v46 }
 0x141   :  { %v625_v49 = vrot.slane %v624_v48, 1 }
 0x143   :  { %v626_v50 = vadd.f32 %v625_v49, %v624_v48 }
 0x145   :  { %633 = vrot.lane.b32.xlu1 %v626_v50, %s983_s0  ;;  %627 = vrot.lane.b32.xlu0 %v626_v50, %s984_s2 }
 0x149   :  { %630 = vrot.lane.b32.xlu0 %v626_v50, %s985_s30 }
 0x1b7   :  { %v628_v35 = vpop.permute.xlu0 %627  ;;  %v634_v55 = vpop.permute.xlu1 %633 }
 0x1b8   :  { %v629_v40 = vadd.f32 %v628_v35, %v626_v50 }
 0x1bb   :  { %v631_v53 = vpop.permute.xlu0 %630 }
 0x1bc   :  { %v632_v54 = vadd.f32 %v631_v53, %v629_v40 }
 0x1be   :  { %v635_v24 = vadd.f32 %v634_v55, %v632_v54 }
 0x1c0   :  { %v1290_v59 = vmul.f32 0.001953125, %v635_v24 }
 0x1c2   :  { %v640_v61 = vrot.slane %v1290_v59, %v1288_v57 }
 0x1c4   :  { %v641_v62 = vsub.f32 %v1222_v60, %v640_v61  ;;  %v642_v0 = vsub.f32 %v1225_v63, %v640_v61  ;;  %v643_v1 = vsub.f32 %v1228_v10, %v640_v61  ;;  %v644_v4 = vsub.f32 %v1231_v13, %v640_v61 }
 0x1c5   :  { %v645_v5 = vsub.f32 %v1234_v25, %v640_v61  ;;  %v646_v11 = vsub.f32 %v1237_v28, %v640_v61  ;;  %v647_v15 = vsub.f32 %v1243_v41, %v640_v61  ;;  %v648_v18 = vsub.f32 %v1247_v45, %v640_v61 }
 0x1c6   :  { %v657_v2 = vmul.f32 %v641_v62, %v641_v62  ;;  %v658_v3 = vmul.f32 %v642_v0, %v642_v0  ;;  %v659_v7 = vmul.f32 %v643_v1, %v643_v1  ;;  %v660_v12 = vmul.f32 %v644_v4, %v644_v4 }
 0x1c7   :  { %v661_v16 = vmul.f32 %v645_v5, %v645_v5  ;;  %v662_v20 = vmul.f32 %v646_v11, %v646_v11  ;;  %v649_v22 = vsub.f32 %v1252_v56, %v640_v61  ;;  %v663_v26 = vmul.f32 %v647_v15, %v647_v15 }
 0x1c8   :  { %v673_v9 = vadd.f32 %v658_v3, %v657_v2  ;;  %v650_v29 = vsub.f32 %v1256_v58, %v640_v61  ;;  %v664_v30 = vmul.f32 %v648_v18, %v648_v18  ;;  %v651_v32 = vsub.f32 %v1261_v6, %v640_v61  ;;  %v704_v18 = vld [vmem:[%s1389_s3] sm:$0x1] }
 0x1c9   :  { %v665_v33 = vmul.f32 %v649_v22, %v649_v22  ;;  %v652_v36 = vsub.f32 %v1264_v8, %v640_v61  ;;  %v653_v43 = vsub.f32 %v1269_v21, %v640_v61  ;;  %v654_v47 = vsub.f32 %v1273_v23, %v640_v61  ;;  %v708_v22 = vld [vmem:[%s1390_s4] sm:$0x1] }
 0x1ca   :  { %v674_v14 = vadd.f32 %v673_v9, %v659_v7  ;;  %v666_v38 = vmul.f32 %v650_v29, %v650_v29  ;;  %v667_v44 = vmul.f32 %v651_v32, %v651_v32  ;;  %v655_v50 = vsub.f32 %v1278_v37, %v640_v61 }
 0x1cb   :  { %v668_v48 = vmul.f32 %v652_v36, %v652_v36  ;;  %v669_v52 = vmul.f32 %v653_v43, %v653_v43  ;;  %v656_v40 = vsub.f32 %v1282_v42, %v640_v61  ;;  %v670_v51 = vmul.f32 %v654_v47, %v654_v47 }
 0x1cc   :  { %v675_v17 = vadd.f32 %v674_v14, %v660_v12  ;;  %v671_v54 = vmul.f32 %v655_v50, %v655_v50 }
 0x1cd   :  { %v672_v24 = vmul.f32 %v656_v40, %v656_v40 }
 0x1ce   :  { %v676_v19 = vadd.f32 %v675_v17, %v661_v16 }
 0x1d0   :  { %v677_v27 = vadd.f32 %v676_v19, %v662_v20 }
 0x1d2   :  { %v678_v31 = vadd.f32 %v677_v27, %v663_v26 }
 0x1d4   :  { %v679_v34 = vadd.f32 %v678_v31, %v664_v30 }
 0x1d6   :  { %v680_v39 = vadd.f32 %v679_v34, %v665_v33 }
 0x1d8   :  { %v681_v46 = vadd.f32 %v680_v39, %v666_v38 }
 0x1da   :  { %v682_v49 = vadd.f32 %v681_v46, %v667_v44 }
 0x1dc   :  { %v683_v35 = vadd.f32 %v682_v49, %v668_v48 }
 0x1de   :  { %v684_v53 = vadd.f32 %v683_v35, %v669_v52 }
 0x1e0   :  { %v685_v55 = vadd.f32 %v684_v53, %v670_v51 }
 0x1e2   :  { %v686_v62 = vadd.f32 %v685_v55, %v671_v54 }
 0x1e4   :  { %v687_v0 = vadd.f32 %v686_v62, %v672_v24 }
 0x1e6   :  { %v688_v1 = vrot.slane %v687_v0, 4 }
 0x1e8   :  { %v689_v2 = vadd.f32 %v688_v1, %v687_v0 }
 0x1ea   :  { %v690_v3 = vrot.slane %v689_v2, 2 }
 0x1ec   :  { %v691_v4 = vadd.f32 %v690_v3, %v689_v2 }
 0x1ee   :  { %v692_v5 = vrot.slane %v691_v4, 1 }
 0x1f0   :  { %v693_v7 = vadd.f32 %v692_v5, %v691_v4 }
 0x1f2   :  { %697 = vrot.lane.b32.xlu0 %v693_v7, %s985_s30  ;;  %694 = vrot.lane.b32.xlu1 %v693_v7, %s984_s2 }
 0x1f6   :  { %700 = vrot.lane.b32.xlu1 %v693_v7, %s983_s0 }
 0x264   :  { %v695_v61 = vpop.permute.xlu1 %694  ;;  %v698_v11 = vpop.permute.xlu0 %697 }
 0x265   :  { %v696_v9 = vadd.f32 %v695_v61, %v693_v7 }
 0x267   :  { %v699_v12 = vadd.f32 %v698_v11, %v696_v9 }
 0x268   :  { %v701_v14 = vpop.permute.xlu1 %700 }
 0x269   :  { %v702_v15 = vadd.f32 %v701_v14, %v699_v12 }
 0x26b   :  { %v703_v16 = vmul.f32 0.001953125, %v702_v15 }
 0x26d   :  { %v705_v17 = vadd.f32 1e-05, %v703_v16 }
 0x26f   :  { %980 = vrsqrt.f32 %v705_v17 }
 0x279   :  { %v981_v20 = vpop.eup %980 }
 0x27a   :  { %v707_v19 = vmul.f32 %v981_v20, %v704_v18 }
 0x27c   :  { %v709_v26 = vmul.f32 %v707_v19, %v1290_v59  ;;  %v715_v27 = vrot.slane %v707_v19, %v1288_v57 }
 0x27e   :  { %v710_v29 = vsub.f32 %v708_v22, %v709_v26  ;;  %v717_v30 = vmul.f32 %v715_v27, %v1222_v60  ;;  %v718_v31 = vmul.f32 %v715_v27, %v1225_v63  ;;  %v719_v32 = vmul.f32 %v715_v27, %v1228_v10 }
 0x27f   :  { %v720_v33 = vmul.f32 %v715_v27, %v1231_v13  ;;  %v721_v34 = vmul.f32 %v715_v27, %v1234_v25  ;;  %v722_v36 = vmul.f32 %v715_v27, %v1237_v28  ;;  %v723_v38 = vmul.f32 %v715_v27, %v1243_v41 }
 0x280   :  { %v724_v39 = vmul.f32 %v715_v27, %v1247_v45  ;;  %v725_v59 = vmul.f32 %v715_v27, %v1252_v56  ;;  %v726_v43 = vmul.f32 %v715_v27, %v1256_v58  ;;  %v727_v60 = vmul.f32 %v715_v27, %v1261_v6 }
 0x281   :  { %v728_v63 = vmul.f32 %v715_v27, %v1264_v8  ;;  %v737_v10 = vrot.slane %v710_v29, %v1288_v57  ;;  %v729_v13 = vmul.f32 %v715_v27, %v1269_v21  ;;  %v730_v25 = vmul.f32 %v715_v27, %v1273_v23 }
 0x282   :  { %v731_v28 = vmul.f32 %v715_v27, %v1278_v37  ;;  %v732_v41 = vmul.f32 %v715_v27, %v1282_v42 }
 0x283   :  { %v739_v44 = vadd.f32 %v737_v10, %v717_v30  ;;  %v740_v45 = vadd.f32 %v737_v10, %v718_v31  ;;  %v741_v46 = vadd.f32 %v737_v10, %v719_v32  ;;  %v742_v56 = vadd.f32 %v737_v10, %v720_v33 }
 0x284   :  { %v743_v47 = vadd.f32 %v737_v10, %v721_v34  ;;  %v744_v58 = vadd.f32 %v737_v10, %v722_v36  ;;  %v745_v48 = vadd.f32 %v737_v10, %v723_v38  ;;  %v746_v6 = vadd.f32 %v737_v10, %v724_v39 }
 0x285   :  { %v747_v49 = vadd.f32 %v737_v10, %v725_v59  ;;  %v748_v8 = vadd.f32 %v737_v10, %v726_v43  ;;  %v749_v50 = vadd.f32 %v737_v10, %v727_v60  ;;  %v750_v57 = vadd.f32 %v737_v10, %v728_v63 }
 0x286   :  { %v751_v52 = vadd.f32 %v737_v10, %v729_v13  ;;  %v752_v21 = vadd.f32 %v737_v10, %v730_v25  ;;  %v753_v35 = vadd.f32 %v737_v10, %v731_v28  ;;  %v754_v23 = vadd.f32 %v737_v10, %v732_v41 }
 0x287   :  { %v755_v40 = vmax.f32 %v739_v44, 0.0  ;;  %v756_v37 = vmax.f32 %v740_v45, 0.0  ;;  %v757_v51 = vmax.f32 %v741_v46, 0.0  ;;  %v758_v42 = vmax.f32 %v742_v56, 0.0 }
 0x288   :  { %v759_v53 = vmax.f32 %v743_v47, 0.0  ;;  %v760_v54 = vmax.f32 %v744_v58, 0.0  ;;  %v761_v55 = vmax.f32 %v745_v48, 0.0  ;;  %v762_v24 = vmax.f32 %v746_v6, 0.0 }
 0x289   :  { %v763_v62 = vmax.f32 %v747_v49, 0.0  ;;  %v764_v0 = vmax.f32 %v748_v8, 0.0  ;;  %v765_v1 = vmax.f32 %v749_v50, 0.0  ;;  %v766_v2 = vmax.f32 %v750_v57, 0.0  ;;  %771 = vst [vmem:[%s1391_s5] sm:$0xff] %v755_v40  ;;  %772 = vst [vmem:[%s1391_s5 + $0x8] sm:$0xff] %v756_v37 }
 0x28a   :  { %773 = vst [vmem:[%s1391_s5 + $0x10] sm:$0xff] %v757_v51  ;;  %774 = vst [vmem:[%s1391_s5 + $0x18] sm:$0xff] %v758_v42  ;;  %v767_v3 = vmax.f32 %v751_v52, 0.0  ;;  %v768_v4 = vmax.f32 %v752_v21, 0.0  ;;  %v769_v5 = vmax.f32 %v753_v35, 0.0  ;;  %v770_v7 = vmax.f32 %v754_v23, 0.0 }
 0x28b   :  { %775 = vst [vmem:[%s1391_s5 + $0x20] sm:$0xff] %v759_v53  ;;  %776 = vst [vmem:[%s1391_s5 + $0x28] sm:$0xff] %v760_v54 }
 0x28c   :  { %777 = vst [vmem:[%s1391_s5 + $0x30] sm:$0xff] %v761_v55  ;;  %778 = vst [vmem:[%s1391_s5 + $0x38] sm:$0xff] %v762_v24 }
 0x28d   :  { %779 = vst [vmem:[%s1391_s5 + $0x40] sm:$0xff] %v763_v62  ;;  %780 = vst [vmem:[%s1391_s5 + $0x48] sm:$0xff] %v764_v0 }
 0x28e   :  { %781 = vst [vmem:[%s1391_s5 + $0x50] sm:$0xff] %v765_v1  ;;  %782 = vst [vmem:[%s1391_s5 + $0x58] sm:$0xff] %v766_v2 }
 0x28f   :  { %783 = vst [vmem:[%s1391_s5 + $0x60] sm:$0xff] %v767_v3  ;;  %784 = vst [vmem:[%s1391_s5 + $0x68] sm:$0xff] %v768_v4 }
 0x290   :  { %785 = vst [vmem:[%s1391_s5 + $0x70] sm:$0xff] %v769_v5  ;;  %786 = vst [vmem:[%s1391_s5 + $0x78] sm:$0xff] %v770_v7 }

// kernel: decoder_forward.9
= control target key start
LH: loop header
LB: loop body
LE: loop exit
PB: predicated region body
PF: predicated region fallthrough
CT: control target
= control target key end

     0   :  { %s1044_s12 = smov 0   ;;  %s1221_s0 = inlined_call_operand.vmem [shape: bf16[512,256], index: 0, kind: input, shape index: {}]   ;;  %s1222_s1 = inlined_call_operand.vmem [shape: bf16[256,128], index: 1, kind: input, shape index: {}]   ;;  %s1223_s2 = inlined_call_operand.vmem [shape: f32[1,128], index: 2, kind: input, shape index: {}]   ;;  %s1224_s3 = inlined_call_operand.vmem [shape: f32[512,128], index: 3, kind: output, shape index: {}]  }
   0x1 LB: > { %s754_s13 = sadd.s32 4294967295, %s1022_s12   ;;  %p758_p0 = scmp.ge.s32.totalorder %s1022_s12, 1  ;;  %s1022_s12 = sphi %s1044_s12, %s13_s12  }
   0x2   : > { %p139_p1 = scmp.lt.s32.totalorder %s1022_s12, 3 }
   0x4   : > { %p140_p2 = pnand %p758_p0, %p139_p1 }
   0x5   : > { %v952_v0 = vld [vmem:[%s1222_s1 + $0x40] sm:$0xff] (!%p140_p2)   ;;  %s759_s16 = sshll.u32 (!%p140_p2), %s754_s13, 5  ;;  %v954_v2 = vld [vmem:[%s1222_s1 + $0x48] sm:$0xff] (!%p140_p2)   ;;  %v956_v4 = vld [vmem:[%s1222_s1 + $0x50] sm:$0xff] (!%p140_p2)  }
   0x6   : > { %143 = sbr.rel (%p140_p2) target bundleno = 314 (0x13a), region = 32  ;;  %v953_v1 = vld [vmem:[%s1222_s1] sm:$0xff] (!%p140_p2)   ;;  %816 = vmatprep.subr.bf16.mxu0 (!%p140_p2), %v952_v0  ;;  %928 = vmatprep.subr.bf16.mxu1 (!%p140_p2), %v952_v0  ;;  %v955_v3 = vld [vmem:[%s1222_s1 + $0x8] sm:$0xff] (!%p140_p2)   ;;  %p165_p3 = scmp.lt.s32.totalorder (!%p140_p2), %s759_s16, 63  ;;  %v957_v5 = vld [vmem:[%s1222_s1 + $0x10] sm:$0xff] (!%p140_p2)  }
   0x7   : > { %817 = vmatpush3.bf16.msra.mxu0 (!%p140_p2), %v953_v1  ;;  %936 = vmatpush3.bf16.msra.mxu1 (!%p140_p2), %v953_v1  ;;  %v958_v6 = vld [vmem:[%s1222_s1 + $0x58] sm:$0xff] (!%p140_p2)   ;;  %v960_v8 = vld [vmem:[%s1222_s1 + $0x60] sm:$0xff] (!%p140_p2)   ;;  %v962_v10 = vld [vmem:[%s1222_s1 + $0x68] sm:$0xff] (!%p140_p2)  }
   0x8   : > { %818 = vmatprep.subr.bf16.mxu0 (!%p140_p2), %v954_v2  ;;  %929 = vmatprep.subr.bf16.mxu1 (!%p140_p2), %v954_v2  ;;  %v959_v7 = vld [vmem:[%s1222_s1 + $0x18] sm:$0xff] (!%p140_p2)   ;;  %v961_v9 = vld [vmem:[%s1222_s1 + $0x20] sm:$0xff] (!%p140_p2)   ;;  %v963_v13 = vld [vmem:[%s1222_s1 + $0x28] sm:$0xff] (!%p140_p2)  }
   0x9   : > { %v964_v14 = vld [vmem:[%s1222_s1 + $0x70] sm:$0xff] (!%p140_p2)   ;;  %v966_v16 = vld [vmem:[%s1222_s1 + $0x78] sm:$0xff] (!%p140_p2)   ;;  %v1145_v50 = vld [vmem:[%s1223_s2] ss:$0 sm:$0xff] (!%p140_p2) }
   0xa   : > { %v965_v15 = vld [vmem:[%s1222_s1 + $0x30] sm:$0xff] (!%p140_p2)   ;;  %v967_v17 = vld [vmem:[%s1222_s1 + $0x38] sm:$0xff] (!%p140_p2)  }
   0xb   : > { %819 = vmatpush3.bf16.msra.mxu0 (!%p140_p2), %v955_v3  ;;  %937 = vmatpush3.bf16.msra.mxu1 (!%p140_p2), %v955_v3 }
   0xc   : > { %820 = vmatprep.subr.bf16.mxu0 (!%p140_p2), %v956_v4  ;;  %930 = vmatprep.subr.bf16.mxu1 (!%p140_p2), %v956_v4 }
   0xd   : > { %s1226_s16 = smov (!%p165_p3, %s759_s16), 63 }
   0xe   : > { %s815_s4 = sshll.u32 %s1226_s16, 3 }
   0xf   : > { %821 = vmatpush3.bf16.msra.mxu0 %v957_v5  ;;  %938 = vmatpush3.bf16.msra.mxu1 %v957_v5  ;;  %s1087_s9 = scalar_lea.vmem %s1221_s0, %s815_s4  ;;  %s1152_s30 = scalar_lea.vmem %s1224_s3, %s815_s4 }
  0x10   : > { %822 = vmatprep.subr.bf16.mxu0 %v958_v6  ;;  %931 = vmatprep.subr.bf16.mxu1 %v958_v6  ;;  %v970_v11 = vld [vmem:[%s1087_s9 + $0x4] ss:$8 sps:$4 sm:$0xff]   ;;  %v968_v18 = vld [vmem:[%s1087_s9] ss:$8 sps:$4 sm:$0xff]   ;;  %v974_v20 = vld [vmem:[%s1087_s9 + $0x14] ss:$8 sps:$4 sm:$0xff]  }
  0x11   : > { %v973_v12 = vld [vmem:[%s1087_s9 + $0x84] ss:$8 sps:$4 sm:$0xff]   ;;  %537 = vmatprep.mubr.bf16.mxu0 %v970_v11  ;;  %v971_v19 = vld [vmem:[%s1087_s9 + $0x80] ss:$8 sps:$4 sm:$0xff]   ;;  %v976_v21 = vld [vmem:[%s1087_s9 + $0x94] ss:$8 sps:$4 sm:$0xff]  }
  0x12   : > { %601 = vmatprep.mubr.bf16.mxu1 %v973_v12  ;;  %v978_v22 = vld [vmem:[%s1087_s9 + $0x10] ss:$8 sps:$4 sm:$0xff]   ;;  %v980_v24 = vld [vmem:[%s1087_s9 + $0x24] ss:$8 sps:$4 sm:$0xff]   ;;  %v984_v26 = vld [vmem:[%s1087_s9 + $0x20] ss:$8 sps:$4 sm:$0xff]  }
  0x13   : > { %823 = vmatpush3.bf16.msra.mxu0 %v959_v7  ;;  %939 = vmatpush3.bf16.msra.mxu1 %v959_v7  ;;  %v979_v23 = vld [vmem:[%s1087_s9 + $0x90] ss:$8 sps:$4 sm:$0xff]   ;;  %v982_v25 = vld [vmem:[%s1087_s9 + $0xa4] ss:$8 sps:$4 sm:$0xff]   ;;  %v985_v27 = vld [vmem:[%s1087_s9 + $0xa0] ss:$8 sps:$4 sm:$0xff]  }
  0x14   : > { %824 = vmatprep.subr.bf16.mxu0 %v960_v8  ;;  %932 = vmatprep.subr.bf16.mxu1 %v960_v8  ;;  %v986_v28 = vld [vmem:[%s1087_s9 + $0x34] ss:$8 sps:$4 sm:$0xff]   ;;  %v990_v30 = vld [vmem:[%s1087_s9 + $0x30] ss:$8 sps:$4 sm:$0xff]   ;;  %v992_v32 = vld [vmem:[%s1087_s9 + $0x44] ss:$8 sps:$4 sm:$0xff]  }
  0x15   : > { %v988_v29 = vld [vmem:[%s1087_s9 + $0xb4] ss:$8 sps:$4 sm:$0xff]   ;;  %v991_v31 = vld [vmem:[%s1087_s9 + $0xb0] ss:$8 sps:$4 sm:$0xff]   ;;  %v994_v33 = vld [vmem:[%s1087_s9 + $0xc4] ss:$8 sps:$4 sm:$0xff]  }
  0x16   : > { %v996_v34 = vld [vmem:[%s1087_s9 + $0x40] ss:$8 sps:$4 sm:$0xff]   ;;  %v998_v36 = vld [vmem:[%s1087_s9 + $0x54] ss:$8 sps:$4 sm:$0xff]   ;;  %v1002_v38 = vld [vmem:[%s1087_s9 + $0x50] ss:$8 sps:$4 sm:$0xff]  }
  0x17   : > { %825 = vmatpush3.bf16.msra.mxu0 %v961_v9  ;;  %940 = vmatpush3.bf16.msra.mxu1 %v961_v9  ;;  %v997_v35 = vld [vmem:[%s1087_s9 + $0xc0] ss:$8 sps:$4 sm:$0xff]   ;;  %v1000_v37 = vld [vmem:[%s1087_s9 + $0xd4] ss:$8 sps:$4 sm:$0xff]   ;;  %v1003_v39 = vld [vmem:[%s1087_s9 + $0xd0] ss:$8 sps:$4 sm:$0xff]  }
  0x18   : > { %826 = vmatprep.subr.bf16.mxu0 %v962_v10  ;;  %933 = vmatprep.subr.bf16.mxu1 %v962_v10  ;;  %v1004_v40 = vld [vmem:[%s1087_s9 + $0x64] ss:$8 sps:$4 sm:$0xff]   ;;  %v1008_v42 = vld [vmem:[%s1087_s9 + $0x60] ss:$8 sps:$4 sm:$0xff]   ;;  %v1010_v44 = vld [vmem:[%s1087_s9 + $0x74] ss:$8 sps:$4 sm:$0xff]  }
  0x19   : > { %v1006_v41 = vld [vmem:[%s1087_s9 + $0xe4] ss:$8 sps:$4 sm:$0xff]   ;;  %v1009_v43 = vld [vmem:[%s1087_s9 + $0xe0] ss:$8 sps:$4 sm:$0xff]   ;;  %v1012_v45 = vld [vmem:[%s1087_s9 + $0xf4] ss:$8 sps:$4 sm:$0xff]  }
  0x1a   : > { %v1014_v46 = vld [vmem:[%s1087_s9 + $0x70] ss:$8 sps:$4 sm:$0xff]  }
  0x1b   : > { %827 = vmatpush3.bf16.msra.mxu0 %v963_v13  ;;  %941 = vmatpush3.bf16.msra.mxu1 %v963_v13  ;;  %v1015_v47 = vld [vmem:[%s1087_s9 + $0xf0] ss:$8 sps:$4 sm:$0xff]  }
  0x1c   : > { %828 = vmatprep.subr.bf16.mxu0 %v964_v14  ;;  %934 = vmatprep.subr.bf16.mxu1 %v964_v14 }
  0x1f   : > { %829 = vmatpush3.bf16.msra.mxu0 %v965_v15  ;;  %942 = vmatpush3.bf16.msra.mxu1 %v965_v15 }
  0x20   : > { %830 = vmatprep.subr.bf16.mxu0 %v966_v16  ;;  %935 = vmatprep.subr.bf16.mxu1 %v966_v16 }
  0x23   : > { %831 = vmatpush3.bf16.msra.mxu0 %v967_v17  ;;  %943 = vmatpush3.bf16.msra.mxu1 %v967_v17 }
  0x26   : > { %538 = vmatmul.mubr.bf16.vlgmr.msra.gmra.mrb[0].mxu0 %v968_v18  ;;  %602 = vmatmul.mubr.bf16.vlgmr.msra.gmra.mrb[0].mxu1 %v971_v19 }
  0x27   : > { %545 = vmatprep.mubr.bf16.mxu0 %v974_v20  ;;  %609 = vmatprep.mubr.bf16.mxu1 %v976_v21 }
  0x2e   : > { %546 = vmatmul.mubr.bf16.gmra.mrb[4].mxu0 %v978_v22  ;;  %610 = vmatmul.mubr.bf16.gmra.mrb[4].mxu1 %v979_v23 }
  0x2f   : > { %553 = vmatprep.mubr.bf16.mxu0 %v980_v24  ;;  %617 = vmatprep.mubr.bf16.mxu1 %v982_v25 }
  0x36   : > { %554 = vmatmul.mubr.bf16.gmra.mrb[8].mxu0 %v984_v26  ;;  %618 = vmatmul.mubr.bf16.gmra.mrb[8].mxu1 %v985_v27 }
  0x37   : > { %561 = vmatprep.mubr.bf16.mxu0 %v986_v28  ;;  %625 = vmatprep.mubr.bf16.mxu1 %v988_v29 }
  0x3e   : > { %562 = vmatmul.mubr.bf16.gmra.mrb[12].mxu0 %v990_v30  ;;  %626 = vmatmul.mubr.bf16.gmra.mrb[12].mxu1 %v991_v31 }
  0x3f   : > { %569 = vmatprep.mubr.bf16.mxu0 %v992_v32  ;;  %633 = vmatprep.mubr.bf16.mxu1 %v994_v33 }
  0x46   : > { %570 = vmatmul.mubr.bf16.gmra.mrb[16].mxu0 %v996_v34  ;;  %634 = vmatmul.mubr.bf16.gmra.mrb[16].mxu1 %v997_v35 }
  0x47   : > { %577 = vmatprep.mubr.bf16.mxu0 %v998_v36  ;;  %641 = vmatprep.mubr.bf16.mxu1 %v1000_v37 }
  0x4e   : > { %578 = vmatmul.mubr.bf16.gmra.mrb[20].mxu0 %v1002_v38  ;;  %642 = vmatmul.mubr.bf16.gmra.mrb[20].mxu1 %v1003_v39 }
  0x4f   : > { %585 = vmatprep.mubr.bf16.mxu0 %v1004_v40  ;;  %649 = vmatprep.mubr.bf16.mxu1 %v1006_v41 }
  0x56   : > { %586 = vmatmul.mubr.bf16.gmra.mrb[24].mxu0 %v1008_v42  ;;  %650 = vmatmul.mubr.bf16.gmra.mrb[24].mxu1 %v1009_v43 }
  0x57   : > { %593 = vmatprep.mubr.bf16.mxu0 %v1010_v44  ;;  %657 = vmatprep.mubr.bf16.mxu1 %v1012_v45 }
  0x5e   : > { %594 = vmatmul.mubr.bf16.gmra.mrb[28].mxu0 %v1014_v46  ;;  %658 = vmatmul.mubr.bf16.gmra.mrb[28].mxu1 %v1015_v47 }
  0xf9   : > { %v832_v48 = vpop.f32.mrb[0].mxu0  ;;  %v880_v49 = vpop.f32.mrb[0].mxu1 }
  0xfa   : > { %v833_v51 = vpop.f32.mrb[1].mxu0  ;;  %v881_v52 = vpop.f32.mrb[1].mxu1 }
  0xfb   : > { %v834_v53 = vadd.f32 %v833_v51, %v832_v48  ;;  %v882_v54 = vadd.f32 %v881_v52, %v880_v49  ;;  %v835_v55 = vpop.f32.mrb[2].mxu0  ;;  %v883_v56 = vpop.f32.mrb[2].mxu1 }
  0xfc   : > { %v836_v57 = vpop.f32.mrb[3].mxu0  ;;  %v884_v58 = vpop.f32.mrb[3].mxu1 }
  0xfd   : > { %v540_v59 = vadd.f32 %v834_v53, %v1145_v50  ;;  %v604_v60 = vadd.f32 %v882_v54, %v1145_v50  ;;  %v837_v61 = vadd.f32 %v836_v57, %v835_v55  ;;  %v885_v62 = vadd.f32 %v884_v58, %v883_v56 }
  0xff   : > { %666 = vst [vmem:[%s1152_s30] sm:$0xff] %v540_v59  ;;  %682 = vst [vmem:[%s1152_s30 + $0x80] sm:$0xff] %v604_v60  ;;  %v543_v63 = vadd.f32 %v837_v61, %v1145_v50  ;;  %v607_v0 = vadd.f32 %v885_v62, %v1145_v50 }
 0x101   : > { %667 = vst [vmem:[%s1152_s30 + $0x8] sm:$0xff] %v543_v63  ;;  %683 = vst [vmem:[%s1152_s30 + $0x88] sm:$0xff] %v607_v0  ;;  %v838_v1 = vpop.f32.mrb[4].mxu0  ;;  %v886_v2 = vpop.f32.mrb[4].mxu1 }
 0x102   : > { %v839_v3 = vpop.f32.mrb[5].mxu0  ;;  %v887_v4 = vpop.f32.mrb[5].mxu1 }
 0x103   : > { %v840_v5 = vadd.f32 %v839_v3, %v838_v1  ;;  %v888_v6 = vadd.f32 %v887_v4, %v886_v2  ;;  %v841_v7 = vpop.f32.mrb[6].mxu0  ;;  %v889_v8 = vpop.f32.mrb[6].mxu1 }
 0x104   : > { %v842_v9 = vpop.f32.mrb[7].mxu0  ;;  %v890_v10 = vpop.f32.mrb[7].mxu1 }
 0x105   : > { %v548_v11 = vadd.f32 %v840_v5, %v1145_v50  ;;  %v612_v12 = vadd.f32 %v888_v6, %v1145_v50  ;;  %v843_v13 = vadd.f32 %v842_v9, %v841_v7  ;;  %v891_v14 = vadd.f32 %v890_v10, %v889_v8 }
 0x107   : > { %668 = vst [vmem:[%s1152_s30 + $0x10] sm:$0xff] %v548_v11  ;;  %684 = vst [vmem:[%s1152_s30 + $0x90] sm:$0xff] %v612_v12  ;;  %v551_v15 = vadd.f32 %v843_v13, %v1145_v50  ;;  %v615_v16 = vadd.f32 %v891_v14, %v1145_v50 }
 0x109   : > { %669 = vst [vmem:[%s1152_s30 + $0x18] sm:$0xff] %v551_v15  ;;  %685 = vst [vmem:[%s1152_s30 + $0x98] sm:$0xff] %v615_v16  ;;  %v844_v17 = vpop.f32.mrb[8].mxu0  ;;  %v892_v18 = vpop.f32.mrb[8].mxu1 }
 0x10a   : > { %v845_v19 = vpop.f32.mrb[9].mxu0  ;;  %v893_v20 = vpop.f32.mrb[9].mxu1 }
 0x10b   : > { %v846_v21 = vadd.f32 %v845_v19, %v844_v17  ;;  %v894_v22 = vadd.f32 %v893_v20, %v892_v18  ;;  %v847_v23 = vpop.f32.mrb[10].mxu0  ;;  %v895_v24 = vpop.f32.mrb[10].mxu1 }
 0x10c   : > { %v848_v25 = vpop.f32.mrb[11].mxu0  ;;  %v896_v26 = vpop.f32.mrb[11].mxu1 }
 0x10d   : > { %v556_v27 = vadd.f32 %v846_v21, %v1145_v50  ;;  %v620_v28 = vadd.f32 %v894_v22, %v1145_v50  ;;  %v849_v29 = vadd.f32 %v848_v25, %v847_v23  ;;  %v897_v30 = vadd.f32 %v896_v26, %v895_v24 }
 0x10f   : > { %670 = vst [vmem:[%s1152_s30 + $0x20] sm:$0xff] %v556_v27  ;;  %686 = vst [vmem:[%s1152_s30 + $0xa0] sm:$0xff] %v620_v28  ;;  %v559_v31 = vadd.f32 %v849_v29, %v1145_v50  ;;  %v623_v32 = vadd.f32 %v897_v30, %v1145_v50 }
 0x111   : > { %671 = vst [vmem:[%s1152_s30 + $0x28] sm:$0xff] %v559_v31  ;;  %687 = vst [vmem:[%s1152_s30 + $0xa8] sm:$0xff] %v623_v32  ;;  %v850_v33 = vpop.f32.mrb[12].mxu0  ;;  %v898_v34 = vpop.f32.mrb[12].mxu1 }
 0x112   : > { %v851_v35 = vpop.f32.mrb[13].mxu0  ;;  %v899_v36 = vpop.f32.mrb[13].mxu1 }
 0x113   : > { %v852_v37 = vadd.f32 %v851_v35, %v850_v33  ;;  %v900_v38 = vadd.f32 %v899_v36, %v898_v34  ;;  %v853_v39 = vpop.f32.mrb[14].mxu0  ;;  %v901_v40 = vpop.f32.mrb[14].mxu1 }
 0x114   : > { %v854_v41 = vpop.f32.mrb[15].mxu0  ;;  %v902_v42 = vpop.f32.mrb[15].mxu1 }
 0x115   : > { %v564_v43 = vadd.f32 %v852_v37, %v1145_v50  ;;  %v628_v44 = vadd.f32 %v900_v38, %v1145_v50  ;;  %v855_v45 = vadd.f32 %v854_v41, %v853_v39  ;;  %v903_v46 = vadd.f32 %v902_v42, %v901_v40 }
 0x117   : > { %672 = vst [vmem:[%s1152_s30 + $0x30] sm:$0xff] %v564_v43  ;;  %688 = vst [vmem:[%s1152_s30 + $0xb0] sm:$0xff] %v628_v44  ;;  %v567_v47 = vadd.f32 %v855_v45, %v1145_v50  ;;  %v631_v48 = vadd.f32 %v903_v46, %v1145_v50 }
 0x119   : > { %673 = vst [vmem:[%s1152_s30 + $0x38] sm:$0xff] %v567_v47  ;;  %689 = vst [vmem:[%s1152_s30 + $0xb8] sm:$0xff] %v631_v48  ;;  %v856_v49 = vpop.f32.mrb[16].mxu0  ;;  %v904_v51 = vpop.f32.mrb[16].mxu1 }
 0x11a   : > { %v857_v52 = vpop.f32.mrb[17].mxu0  ;;  %v905_v53 = vpop.f32.mrb[17].mxu1 }
 0x11b   : > { %v858_v54 = vadd.f32 %v857_v52, %v856_v49  ;;  %v906_v55 = vadd.f32 %v905_v53, %v904_v51  ;;  %v859_v56 = vpop.f32.mrb[18].mxu0  ;;  %v907_v57 = vpop.f32.mrb[18].mxu1 }
 0x11c   : > { %v860_v58 = vpop.f32.mrb[19].mxu0  ;;  %v908_v59 = vpop.f32.mrb[19].mxu1 }
 0x11d   : > { %v572_v60 = vadd.f32 %v858_v54, %v1145_v50  ;;  %v636_v61 = vadd.f32 %v906_v55, %v1145_v50  ;;  %v861_v62 = vadd.f32 %v860_v58, %v859_v56  ;;  %v909_v63 = vadd.f32 %v908_v59, %v907_v57 }
 0x11f   : > { %674 = vst [vmem:[%s1152_s30 + $0x40] sm:$0xff] %v572_v60  ;;  %690 = vst [vmem:[%s1152_s30 + $0xc0] sm:$0xff] %v636_v61  ;;  %v575_v0 = vadd.f32 %v861_v62, %v1145_v50  ;;  %v639_v1 = vadd.f32 %v909_v63, %v1145_v50 }
 0x121   : > { %675 = vst [vmem:[%s1152_s30 + $0x48] sm:$0xff] %v575_v0  ;;  %691 = vst [vmem:[%s1152_s30 + $0xc8] sm:$0xff] %v639_v1  ;;  %v862_v2 = vpop.f32.mrb[20].mxu0  ;;  %v910_v3 = vpop.f32.mrb[20].mxu1 }
 0x122   : > { %v863_v4 = vpop.f32.mrb[21].mxu0  ;;  %v911_v5 = vpop.f32.mrb[21].mxu1 }
 0x123   : > { %v864_v6 = vadd.f32 %v863_v4, %v862_v2  ;;  %v912_v7 = vadd.f32 %v911_v5, %v910_v3  ;;  %v865_v8 = vpop.f32.mrb[22].mxu0  ;;  %v913_v9 = vpop.f32.mrb[22].mxu1 }
 0x124   : > { %v866_v10 = vpop.f32.mrb[23].mxu0  ;;  %v914_v11 = vpop.f32.mrb[23].mxu1 }
 0x125   : > { %v580_v12 = vadd.f32 %v864_v6, %v1145_v50  ;;  %v644_v13 = vadd.f32 %v912_v7, %v1145_v50  ;;  %v867_v14 = vadd.f32 %v866_v10, %v865_v8  ;;  %v915_v15 = vadd.f32 %v914_v11, %v913_v9 }
 0x127   : > { %676 = vst [vmem:[%s1152_s30 + $0x50] sm:$0xff] %v580_v12  ;;  %692 = vst [vmem:[%s1152_s30 + $0xd0] sm:$0xff] %v644_v13  ;;  %v583_v16 = vadd.f32 %v867_v14, %v1145_v50  ;;  %v647_v17 = vadd.f32 %v915_v15, %v1145_v50 }
 0x129   : > { %677 = vst [vmem:[%s1152_s30 + $0x58] sm:$0xff] %v583_v16  ;;  %693 = vst [vmem:[%s1152_s30 + $0xd8] sm:$0xff] %v647_v17  ;;  %v868_v18 = vpop.f32.mrb[24].mxu0  ;;  %v916_v19 = vpop.f32.mrb[24].mxu1 }
 0x12a   : > { %v869_v20 = vpop.f32.mrb[25].mxu0  ;;  %v917_v21 = vpop.f32.mrb[25].mxu1 }
 0x12b   : > { %v870_v22 = vadd.f32 %v869_v20, %v868_v18  ;;  %v918_v23 = vadd.f32 %v917_v21, %v916_v19  ;;  %v871_v24 = vpop.f32.mrb[26].mxu0  ;;  %v919_v25 = vpop.f32.mrb[26].mxu1 }
 0x12c   : > { %v872_v26 = vpop.f32.mrb[27].mxu0  ;;  %v920_v27 = vpop.f32.mrb[27].mxu1 }
 0x12d   : > { %v588_v28 = vadd.f32 %v870_v22, %v1145_v50  ;;  %v652_v29 = vadd.f32 %v918_v23, %v1145_v50  ;;  %v873_v30 = vadd.f32 %v872_v26, %v871_v24  ;;  %v921_v31 = vadd.f32 %v920_v27, %v919_v25 }
 0x12f   : > { %678 = vst [vmem:[%s1152_s30 + $0x60] sm:$0xff] %v588_v28  ;;  %694 = vst [vmem:[%s1152_s30 + $0xe0] sm:$0xff] %v652_v29  ;;  %v591_v32 = vadd.f32 %v873_v30, %v1145_v50  ;;  %v655_v33 = vadd.f32 %v921_v31, %v1145_v50 }
 0x131   : > { %679 = vst [vmem:[%s1152_s30 + $0x68] sm:$0xff] %v591_v32  ;;  %695 = vst [vmem:[%s1152_s30 + $0xe8] sm:$0xff] %v655_v33  ;;  %v874_v34 = vpop.f32.mrb[28].mxu0  ;;  %v922_v35 = vpop.f32.mrb[28].mxu1 }
 0x132   : > { %v875_v36 = vpop.f32.mrb[29].mxu0  ;;  %v923_v37 = vpop.f32.mrb[29].mxu1 }
 0x133   : > { %v876_v38 = vadd.f32 %v875_v36, %v874_v34  ;;  %v924_v39 = vadd.f32 %v923_v37, %v922_v35  ;;  %v877_v40 = vpop.f32.mrb[30].mxu0  ;;  %v925_v41 = vpop.f32.mrb[30].mxu1 }
 0x134   : > { %v878_v42 = vpop.f32.mrb[31].mxu0  ;;  %v926_v43 = vpop.f32.mrb[31].mxu1 }
 0x135   : > { %v596_v44 = vadd.f32 %v876_v38, %v1145_v50  ;;  %v660_v45 = vadd.f32 %v924_v39, %v1145_v50  ;;  %v879_v46 = vadd.f32 %v878_v42, %v877_v40  ;;  %v927_v47 = vadd.f32 %v926_v43, %v925_v41 }
 0x137   : > { %680 = vst [vmem:[%s1152_s30 + $0x70] sm:$0xff] %v596_v44  ;;  %696 = vst [vmem:[%s1152_s30 + $0xf0] sm:$0xff] %v660_v45  ;;  %v599_v48 = vadd.f32 %v879_v46, %v1145_v50  ;;  %v663_v49 = vadd.f32 %v927_v47, %v1145_v50 }
 0x139   : > { %681 = vst [vmem:[%s1152_s30 + $0x78] sm:$0xff] %v599_v48  ;;  %697 = vst [vmem:[%s1152_s30 + $0xf8] sm:$0xff] %v663_v49 }
 0x13a PF: > { %s13_s12 = sadd.s32 1, %s1022_s12  }
 0x13b   : > { %p10_p4 = scmp.ge.s32.totalorder %s13_s12, 4  }
 0x13d   :  { %12 = sbr.rel (!%p10_p4) target bundleno = 1 (0x1), region = 62 }

</bundles_post_ra>
